<compile_context>
chip_gen: v5e
topology: v5e:2x2
jax: 0.10.0
libtpu: 0.0.40
codegen_flags: <defaults>
</compile_context>

<pallas_src>
import functools
import math

import jax
import jax.numpy as jnp
from jax.experimental import pallas as pl
from jax.experimental.pallas import tpu as pltpu


# ----------------------------------------------------------------------------
# helpers
# ----------------------------------------------------------------------------
def _pick_tile(total, target, mult=8):
    """Largest divisor of `total` that is <= target and a multiple of `mult`
    (falls back to `total`, i.e. a single block)."""
    if total <= target:
        return total
    for t in range(target, mult - 1, -1):
        if total % t == 0 and t % mult == 0:
            return t
    return total


def _accum(acc_ref, v):
    """Accumulate the row-sum of v (R, C) into acc_ref ((rows, C)).
    rows==8: per-tile reduce is pure VPU vreg adds (cross-sublane XLU reduce is
    deferred to the epilogue); rows==1: plain reduction."""
    rows = acc_ref.shape[0]
    if rows > 1:
        acc_ref[...] += jnp.sum(v.reshape(-1, rows, v.shape[-1]), axis=0)
    else:
        acc_ref[...] += jnp.sum(v, axis=0, keepdims=True)


# ----------------------------------------------------------------------------
# Kernel 1: fused stem (K=3 pointwise conv on the VPU) + shared base projection
#           (bf16 MXU) + folded BN shifts + ReLU + GeM(p=3) + spatial-mean
#           pooling.  grid = (modality, batch, S-tiles); the stem intermediate
#           never leaves VMEM and the pooled stats are emitted on the last
#           S-tile, so the big activation is written once and only re-read by
#           the AFF kernel.
# ----------------------------------------------------------------------------
def _stem_base_pool_kernel(x_ref, ws_ref, ts_ref, wb_ref, tb_ref,
                           o_ref, gem_ref, mean_ref,
                           acc3_ref, acc1_ref, *, cin, inv_s, eps):
    s_idx = pl.program_id(2)

    @pl.when(s_idx == 0)
    def _():
        acc3_ref[...] = jnp.zeros_like(acc3_ref)
        acc1_ref[...] = jnp.zeros_like(acc1_ref)

    x = x_ref[0, 0]                                 # (ts, cin)  f32
    ws = ws_ref[0]                                  # (cin, C)   f32, scale-folded
    # K=cin(=3) contraction as broadcast multiply-adds on the VPU (MXU would be
    # ~3/256 utilized and the (ts, 3) layout is lane-sparse).
    h = x[:, 0:1] * ws[0:1, :]
    for k in range(1, cin):
        h = h + x[:, k:k + 1] * ws[k:k + 1, :]
    h = jnp.maximum(h + ts_ref[0], 0.0)             # (ts, C) f32

    # shared "backbone" projection on the MXU, bf16 operands, f32 accumulate
    y = jnp.dot(h.astype(jnp.bfloat16), wb_ref[...],
                preferred_element_type=jnp.float32)
    y = jnp.maximum(y + tb_ref[...], 0.0)
    o_ref[0, 0] = y

    # fused GeM (p=3; integer cube on the VPU) and plain-mean partial sums
    yc = jnp.maximum(y, eps)
    _accum(acc3_ref, yc * yc * yc)
    _accum(acc1_ref, y)

    @pl.when(s_idx == pl.num_programs(2) - 1)
    def _():
        m3 = jnp.sum(acc3_ref[...], axis=0, keepdims=True) * inv_s
        gem_ref[0, 0] = m3 ** (1.0 / 3.0)           # cbrt only on the tiny (1,C) row
        mean_ref[0, 0] = jnp.sum(acc1_ref[...], axis=0, keepdims=True) * inv_s


def stem_base_pool(xin, w_stem, t_stem, w_base, t_base, *, eps=1e-6, ts_target=512):
    """xin: (2, B, S, cin) f32 -> x (2B, S, C), gem (2B, C), mean (2B, C)."""
    nm, B, S, cin = xin.shape
    C = w_base.shape[1]
    ts = _pick_tile(S, ts_target)
    acc_rows = 8 if ts % 8 == 0 else 1
    x, gem, mean = pl.pallas_call(
        functools.partial(_stem_base_pool_kernel, cin=cin, inv_s=1.0 / S, eps=eps),
        out_shape=(jax.ShapeDtypeStruct((nm, B, S, C), jnp.float32),
                   jax.ShapeDtypeStruct((nm, B, 1, C), jnp.float32),
                   jax.ShapeDtypeStruct((nm, B, 1, C), jnp.float32)),
        grid=(nm, B, S // ts),
        in_specs=[
            pl.BlockSpec((1, 1, ts, cin), lambda m, b, s: (m, b, s, 0)),
            pl.BlockSpec((1, cin, C), lambda m, b, s: (m, 0, 0)),
            pl.BlockSpec((1, 1, C), lambda m, b, s: (m, 0, 0)),
            pl.BlockSpec((C, C), lambda m, b, s: (0, 0)),
            pl.BlockSpec((1, C), lambda m, b, s: (0, 0)),
        ],
        out_specs=(pl.BlockSpec((1, 1, ts, C), lambda m, b, s: (m, b, s, 0)),
                   pl.BlockSpec((1, 1, 1, C), lambda m, b, s: (m, b, 0, 0)),
                   pl.BlockSpec((1, 1, 1, C), lambda m, b, s: (m, b, 0, 0))),
        scratch_shapes=[pltpu.VMEM((acc_rows, C), jnp.float32),
                        pltpu.VMEM((acc_rows, C), jnp.float32)],
        compiler_params=pltpu.CompilerParams(
            dimension_semantics=("parallel", "parallel", "arbitrary")),
    )(xin, w_stem, t_stem, w_base, t_base)
    return (x.reshape(nm * B, S, C),
            gem.reshape(nm * B, C),
            mean.reshape(nm * B, C))


# ----------------------------------------------------------------------------
# Kernel 2 ("head"): BN1d bottleneck (folded scale/shift) + Linear classifier
# fused with the AFF global-attention branch (which only needs the per-sample
# spatial mean).  One launch for all four tiny row matmuls, batched over 2B.
# ----------------------------------------------------------------------------
def _head_kernel(xp_ref, mean_ref, s_ref, t_ref, wcls_ref,
                 wg1_ref, bg1_ref, wg2_ref, bg2_ref,
                 cls_ref, xg_ref):
    # bottleneck BN (eval, folded) + classifier (bias-free Linear)
    xn = xp_ref[...] * s_ref[...] + t_ref[...]
    cls_ref[...] = jnp.dot(xn.astype(jnp.bfloat16), wcls_ref[...],
                           preferred_element_type=jnp.float32)
    # AFF global attention: ga = mean_S(x + residual) = 2*mean_S(x) (residual == x)
    ga = 2.0 * mean_ref[...]
    g = jnp.dot(ga.astype(jnp.bfloat16), wg1_ref[...],
                preferred_element_type=jnp.float32)
    g = jnp.maximum(g + bg1_ref[...], 0.0)
    xg = jnp.dot(g.astype(jnp.bfloat16), wg2_ref[...],
                 preferred_element_type=jnp.float32)
    xg_ref[...] = xg + bg2_ref[...]


def head(x_p, x_mean, bneck_scale, bneck_shift, cls_w, aff):
    N, C = x_p.shape
    K = cls_w.shape[1]
    return pl.pallas_call(
        _head_kernel,
        out_shape=(jax.ShapeDtypeStruct((N, K), jnp.float32),
                   jax.ShapeDtypeStruct((N, C), jnp.float32)),
    )(x_p, x_mean, bneck_scale, bneck_shift, cls_w,
      aff["wg1"], aff["bg1"], aff["wg2"], aff["bg2"])


# ----------------------------------------------------------------------------
# Kernel 3: fused AFF local branch + blend + "+ x_s" residual + GeM pooling,
# S-tiled with a VMEM accumulator.  The activation is streamed ONCE (residual
# is computed in-kernel from x), `feat` never touches HBM.
#   xa   = x + residual                   (residual == x stand-in)
#   xl   = BN(conv(ReLU(BN(conv(xa)))))   (per pixel, bf16 MXU)
#   wei  = sigmoid(xl + xg)               (xg precomputed per sample)
#   feat = 2*x*wei + 2*residual*(1-wei) + x
#   out  = GeM_p=3(feat)
# ----------------------------------------------------------------------------
def _aff_gem_kernel(x_ref, xg_ref, wl1_ref, bl1_ref, wl2_ref, bl2_ref,
                    featp_ref, acc_ref, *, inv_s, eps):
    s_idx = pl.program_id(1)

    @pl.when(s_idx == 0)
    def _():
        acc_ref[...] = jnp.zeros_like(acc_ref)

    x = x_ref[0]                                    # (ts, C) f32
    # TODO(synk): feat_self / feat_cross not defined in source -> residual == x.
    r = x
    xa = x + r

    h = jnp.dot(xa.astype(jnp.bfloat16), wl1_ref[...],
                preferred_element_type=jnp.float32)
    h = jnp.maximum(h + bl1_ref[...], 0.0)
    xl = jnp.dot(h.astype(jnp.bfloat16), wl2_ref[...],
                 preferred_element_type=jnp.float32) + bl2_ref[...]

    wei = jax.nn.sigmoid(xl + xg_ref[0])            # (ts, C), xg broadcast over S

    # AFF blend with the external "+ x_s" residual folded in
    feat = 2.0 * x * wei + 2.0 * r * (1.0 - wei) + x

    # fused GeM(p=3) partial sum (integer cube on the VPU)
    fc = jnp.maximum(feat, eps)
    _accum(acc_ref, fc * fc * fc)

    @pl.when(s_idx == pl.num_programs(1) - 1)
    def _():
        m3 = jnp.sum(acc_ref[...], axis=0, keepdims=True) * inv_s
        featp_ref[0] = m3 ** (1.0 / 3.0)


def aff_fused_gem(x, xg, p, *, eps=1e-6, ts_target=512):
    """x: (N, S, C); xg: (N, C) precomputed global branch.  Returns GeM(feat)."""
    N, S, C = x.shape
    Ci = p["wl1"].shape[1]
    ts = _pick_tile(S, ts_target)
    acc_rows = 8 if ts % 8 == 0 else 1
    wspec = lambda shape: pl.BlockSpec(shape, lambda b, s: (0, 0))
    out = pl.pallas_call(
        functools.partial(_aff_gem_kernel, inv_s=1.0 / S, eps=eps),
        out_shape=jax.ShapeDtypeStruct((N, 1, C), jnp.float32),
        grid=(N, S // ts),
        in_specs=[
            pl.BlockSpec((1, ts, C), lambda b, s: (b, s, 0)),
            pl.BlockSpec((1, 1, C), lambda b, s: (b, 0, 0)),
            wspec((C, Ci)), wspec((1, Ci)),
            wspec((Ci, C)), wspec((1, C)),
        ],
        out_specs=pl.BlockSpec((1, 1, C), lambda b, s: (b, 0, 0)),
        scratch_shapes=[pltpu.VMEM((acc_rows, C), jnp.float32)],
        compiler_params=pltpu.CompilerParams(
            dimension_semantics=("parallel", "arbitrary")),
    )(x, xg.reshape(N, 1, C), p["wl1"], p["bl1"], p["wl2"], p["bl2"])
    return out.reshape(N, C)


# ----------------------------------------------------------------------------
# Parameter construction (deterministic, synthetic weights; BN scale folded
# into the conv-weight columns so kernels only apply a shift).
# ----------------------------------------------------------------------------
def _fold_conv_bn(w, b, gamma, beta, eps=1e-5):
    # eval-mode BN with synthetic running stats (mean=0, var=1)
    s = gamma / jnp.sqrt(1.0 + eps)
    w_f = w * s[None, :]
    shift = b * s + beta
    return w_f, shift.reshape(1, -1)


def init_params(key, *, cin=3, pool_dim=128, r=4, class_num=16):
    ks = iter(jax.random.split(key, 64))
    nrm = lambda shape, std: (std * jax.random.normal(next(ks), shape)).astype(jnp.float32)
    inter = pool_dim // r
    P = {}

    def conv_bn(cin_, cout_, dtype=jnp.float32):
        w = nrm((cin_, cout_), math.sqrt(2.0 / cin_))   # kaiming-like fan-in
        b = nrm((cout_,), 0.01)
        gamma = 1.0 + nrm((cout_,), 0.01)
        beta = nrm((cout_,), 0.01)
        w_f, shift = _fold_conv_bn(w, b, gamma, beta)
        return w_f.astype(dtype), shift.astype(jnp.float32)

    # synthetic modality stems (visible / thermal), stacked on a leading axis,
    # and the shared synthetic backbone projection (bf16 for the MXU)
    wv, tv = conv_bn(cin, pool_dim)                      # f32: used on the VPU
    wt, tt = conv_bn(cin, pool_dim)
    P["stem_w"] = jnp.stack([wv, wt])                    # (2, cin, C)
    P["stem_t"] = jnp.stack([tv, tt])                    # (2, 1, C)
    P["base_w"], P["base_t"] = conv_bn(pool_dim, pool_dim, jnp.bfloat16)

    # AFF fusion (local + global branches)
    aff = {}
    aff["wl1"], aff["bl1"] = conv_bn(pool_dim, inter, jnp.bfloat16)
    aff["wl2"], aff["bl2"] = conv_bn(inter, pool_dim, jnp.bfloat16)
    aff["wg1"], aff["bg1"] = conv_bn(pool_dim, inter, jnp.bfloat16)
    aff["wg2"], aff["bg2"] = conv_bn(inter, pool_dim, jnp.bfloat16)
    P["aff"] = aff

    # bottleneck BN1d: weight ~ N(1, 0.01), bias = 0 (weights_init_kaiming), eval mode
    bn_gamma = 1.0 + nrm((pool_dim,), 0.01)
    P["bneck_scale"] = (bn_gamma / jnp.sqrt(1.0 + 1e-5)).reshape(1, -1)
    P["bneck_shift"] = jnp.zeros((1, pool_dim), jnp.float32)

    # classifier Linear(pool_dim, class_num, bias=False), weight ~ N(0, 0.001)
    P["cls_w"] = nrm((pool_dim, class_num), 0.001).astype(jnp.bfloat16)
    return P


# ----------------------------------------------------------------------------
# network.forward (mode=0)
# ----------------------------------------------------------------------------
def network_forward(params, x1, x2):
    """x1, x2: NCHW (B, 3, H, W) — same convention as the PyTorch module."""
    B, Cin, H, W = x1.shape
    S = H * W

    def nchw_to_bsc(x):                        # (B, C, H, W) -> (B, S, C)
        return jnp.transpose(x, (0, 2, 3, 1)).reshape(B, S, Cin)

    # Modalities stacked on a leading axis (tiny Cin=3 tensor).  One fused kernel
    # produces the backbone activation x (== torch.cat((visible, thermal), dim=0),
    # channel-last), GeM pool x_p, and the spatial mean — in a single pass; the
    # big activation is written once to HBM.
    xin = jnp.stack([nchw_to_bsc(x1), nchw_to_bsc(x2)])            # (2, B, S, Cin)
    x, x_p, x_mean = stem_base_pool(
        xin, params["stem_w"], params["stem_t"],
        params["base_w"], params["base_t"])                        # (2B,S,C),(2B,C),(2B,C)

    # TODO(synk): feat_self / feat_cross not defined in source -> identity,
    # hence x_s == x (no concatenate copy) and the AFF residual == x.

    # bottleneck + classifier and AFF global-attention branch in one tiny launch
    cls_id, xg = head(x_p, x_mean, params["bneck_scale"], params["bneck_shift"],
                      params["cls_w"], params["aff"])              # (2B,K), (2B,C)

    # Fused AFF local branch + blend + "+ x_s" residual + GeM pooling; the
    # activation is streamed once and `feat` never materialized in HBM.
    feat_p = aff_fused_gem(x, xg, params["aff"])                   # (2B, C)

    return {"cls_id": cls_id, "x_p": x_p, "feat_p": feat_p}


if __name__ == "__main__":
    key = jax.random.PRNGKey(0)
    kp, k1, k2 = jax.random.split(key, 3)

    B, Cin, H, W = 2, 3, 8, 8
    pool_dim, class_num = 128, 16

    params = init_params(kp, cin=Cin, pool_dim=pool_dim, r=4, class_num=class_num)
    x1 = jax.random.normal(k1, (B, Cin, H, W), dtype=jnp.float32)
    x2 = jax.random.normal(k2, (B, Cin, H, W), dtype=jnp.float32)

    out = jax.jit(network_forward)(params, x1, x2)
    jax.block_until_ready(out)

    assert out["cls_id"].shape == (2 * B, class_num)
    assert out["x_p"].shape == (2 * B, pool_dim)
    assert out["feat_p"].shape == (2 * B, pool_dim)
    assert all(bool(jnp.all(jnp.isfinite(v))) for v in out.values())
    print("KERNEL_OK")
</pallas_src>

<mosaic_0001>
module attributes {stable_mosaic.version = 11 : i64} {
  func.func @_head_kernel(%arg0: memref<4x128xf32, #tpu.memory_space<vmem>>, %arg1: memref<4x128xf32, #tpu.memory_space<vmem>>, %arg2: memref<1x128xf32, #tpu.memory_space<vmem>>, %arg3: memref<1x128xf32, #tpu.memory_space<vmem>>, %arg4: memref<128x16xbf16, #tpu.memory_space<vmem>>, %arg5: memref<128x32xbf16, #tpu.memory_space<vmem>>, %arg6: memref<1x32xf32, #tpu.memory_space<vmem>>, %arg7: memref<32x128xbf16, #tpu.memory_space<vmem>>, %arg8: memref<1x128xf32, #tpu.memory_space<vmem>>, %arg9: memref<4x16xf32, #tpu.memory_space<vmem>>, %arg10: memref<4x128xf32, #tpu.memory_space<vmem>>) attributes {dimension_semantics = [], scalar_prefetch = 0 : i64, scratch_operands = 0 : i64, tpu.core_type = #tpu.core_type<tc>} {
    %c0 = arith.constant 0 : index
    %c0_0 = arith.constant 0 : index
    %0 = vector.load %arg0[%c0, %c0_0] : memref<4x128xf32, #tpu.memory_space<vmem>>, vector<4x128xf32>
    %c0_1 = arith.constant 0 : index
    %c0_2 = arith.constant 0 : index
    %1 = vector.load %arg2[%c0_1, %c0_2] : memref<1x128xf32, #tpu.memory_space<vmem>>, vector<1x128xf32>
    %2 = vector.broadcast %1 : vector<1x128xf32> to vector<4x128xf32>
    %3 = arith.mulf %0, %2 : vector<4x128xf32>
    %c0_3 = arith.constant 0 : index
    %c0_4 = arith.constant 0 : index
    %4 = vector.load %arg3[%c0_3, %c0_4] : memref<1x128xf32, #tpu.memory_space<vmem>>, vector<1x128xf32>
    %5 = vector.broadcast %4 : vector<1x128xf32> to vector<4x128xf32>
    %6 = arith.addf %3, %5 : vector<4x128xf32>
    %7 = arith.truncf %6 : vector<4x128xf32> to vector<4x128xbf16>
    %c0_5 = arith.constant 0 : index
    %c0_6 = arith.constant 0 : index
    %8 = vector.load %arg4[%c0_5, %c0_6] : memref<128x16xbf16, #tpu.memory_space<vmem>>, vector<128x16xbf16>
    %cst = arith.constant dense<0.000000e+00> : vector<4x16xf32>
    %9 = tpu.matmul %7, %8, %cst {dimension_numbers = #tpu.dot_dimension_numbers<[1], [0], [0], [1], [0, 0, 1, 1], [], []>} : vector<4x128xbf16>, vector<128x16xbf16>, vector<4x16xf32> -> vector<4x16xf32>
    %c0_7 = arith.constant 0 : index
    %c0_8 = arith.constant 0 : index
    %10 = vector.load %arg9[%c0_7, %c0_8] : memref<4x16xf32, #tpu.memory_space<vmem>>, vector<4x16xf32>
    tpu.vector_store %arg9[%c0_7, %c0_8], %9 {strides = array<i32>} : memref<4x16xf32, #tpu.memory_space<vmem>>, vector<4x16xf32>,
    %c0_9 = arith.constant 0 : index
    %c0_10 = arith.constant 0 : index
    %11 = vector.load %arg1[%c0_9, %c0_10] : memref<4x128xf32, #tpu.memory_space<vmem>>, vector<4x128xf32>
    %cst_11 = arith.constant 2.000000e+00 : f32
    %12 = vector.broadcast %cst_11 : f32 to vector<4x128xf32>
    %13 = arith.mulf %12, %11 : vector<4x128xf32>
    %14 = arith.truncf %13 : vector<4x128xf32> to vector<4x128xbf16>
    %c0_12 = arith.constant 0 : index
    %c0_13 = arith.constant 0 : index
    %15 = vector.load %arg5[%c0_12, %c0_13] : memref<128x32xbf16, #tpu.memory_space<vmem>>, vector<128x32xbf16>
    %cst_14 = arith.constant dense<0.000000e+00> : vector<4x32xf32>
    %16 = tpu.matmul %14, %15, %cst_14 {dimension_numbers = #tpu.dot_dimension_numbers<[1], [0], [0], [1], [0, 0, 1, 1], [], []>} : vector<4x128xbf16>, vector<128x32xbf16>, vector<4x32xf32> -> vector<4x32xf32>
    %c0_15 = arith.constant 0 : index
    %c0_16 = arith.constant 0 : index
    %17 = vector.load %arg6[%c0_15, %c0_16] : memref<1x32xf32, #tpu.memory_space<vmem>>, vector<1x32xf32>
    %18 = vector.broadcast %17 : vector<1x32xf32> to vector<4x32xf32>
    %19 = arith.addf %16, %18 : vector<4x32xf32>
    %cst_17 = arith.constant 0.000000e+00 : f32
    %20 = vector.broadcast %cst_17 : f32 to vector<4x32xf32>
    %21 = arith.maximumf %19, %20 : vector<4x32xf32>
    %22 = arith.truncf %21 : vector<4x32xf32> to vector<4x32xbf16>
    %c0_18 = arith.constant 0 : index
    %c0_19 = arith.constant 0 : index
    %23 = vector.load %arg7[%c0_18, %c0_19] : memref<32x128xbf16, #tpu.memory_space<vmem>>, vector<32x128xbf16>
    %cst_20 = arith.constant dense<0.000000e+00> : vector<4x128xf32>
    %24 = tpu.matmul %22, %23, %cst_20 {dimension_numbers = #tpu.dot_dimension_numbers<[1], [0], [0], [1], [0, 0, 1, 1], [], []>} : vector<4x32xbf16>, vector<32x128xbf16>, vector<4x128xf32> -> vector<4x128xf32>
    %c0_21 = arith.constant 0 : index
    %c0_22 = arith.constant 0 : index
    %25 = vector.load %arg8[%c0_21, %c0_22] : memref<1x128xf32, #tpu.memory_space<vmem>>, vector<1x128xf32>
    %26 = vector.broadcast %25 : vector<1x128xf32> to vector<4x128xf32>
    %27 = arith.addf %24, %26 : vector<4x128xf32>
    %c0_23 = arith.constant 0 : index
    %c0_24 = arith.constant 0 : index
    %28 = vector.load %arg10[%c0_23, %c0_24] : memref<4x128xf32, #tpu.memory_space<vmem>>, vector<4x128xf32>
    tpu.vector_store %arg10[%c0_23, %c0_24], %27 {strides = array<i32>} : memref<4x128xf32, #tpu.memory_space<vmem>>, vector<4x128xf32>,
    return
  }
}

module attributes {stable_mosaic.version = 11 : i64} {
  func.func @_stem_base_pool_kernel(%arg0: i32, %arg1: i32, %arg2: i32, %arg3: memref<1x1x64x3xf32, #tpu.memory_space<vmem>>, %arg4: memref<1x3x128xf32, #tpu.memory_space<vmem>>, %arg5: memref<1x1x128xf32, #tpu.memory_space<vmem>>, %arg6: memref<128x128xbf16, #tpu.memory_space<vmem>>, %arg7: memref<1x128xf32, #tpu.memory_space<vmem>>, %arg8: memref<1x1x64x128xf32, #tpu.memory_space<vmem>>, %arg9: memref<1x1x1x128xf32, #tpu.memory_space<vmem>>, %arg10: memref<1x1x1x128xf32, #tpu.memory_space<vmem>>, %arg11: memref<8x128xf32, #tpu.memory_space<vmem>>, %arg12: memref<8x128xf32, #tpu.memory_space<vmem>>) attributes {dimension_semantics = [#tpu.dimension_semantics<parallel>, #tpu.dimension_semantics<parallel>, #tpu.dimension_semantics<arbitrary>], iteration_bounds = array<i64: 2, 2, 1>, scalar_prefetch = 0 : i64, scratch_operands = 2 : i64, tpu.core_type = #tpu.core_type<tc>, window_params = [{transform_indices = @transform_0, window_bounds = array<i64: 1, 1, 64, 3>}, {transform_indices = @transform_1, window_bounds = array<i64: 1, 3, 128>}, {transform_indices = @transform_2, window_bounds = array<i64: 1, 1, 128>}, {pipeline_mode = #tpu.pipeline_mode<synchronous>, transform_indices = @transform_3, window_bounds = array<i64: 128, 128>}, {pipeline_mode = #tpu.pipeline_mode<synchronous>, transform_indices = @transform_4, window_bounds = array<i64: 1, 128>}, {transform_indices = @transform_5, window_bounds = array<i64: 1, 1, 64, 128>}, {transform_indices = @transform_6, window_bounds = array<i64: 1, 1, 1, 128>}, {transform_indices = @transform_7, window_bounds = array<i64: 1, 1, 1, 128>}]} {
    %c0_i32 = arith.constant 0 : i32
    %0 = arith.cmpi eq, %arg2, %c0_i32 : i32
    %1 = arith.extui %0 : i1 to i32
    %c0_i32_0 = arith.constant 0 : i32
    %2 = arith.cmpi ne, %1, %c0_i32_0 : i32
    scf.if %2 {
      %cst_33 = arith.constant 0.000000e+00 : f32
      %58 = vector.broadcast %cst_33 : f32 to vector<8x128xf32>
      %c0_34 = arith.constant 0 : index
      %c0_35 = arith.constant 0 : index
      %59 = vector.load %arg11[%c0_34, %c0_35] : memref<8x128xf32, #tpu.memory_space<vmem>>, vector<8x128xf32>
      tpu.vector_store %arg11[%c0_34, %c0_35], %58 {strides = array<i32>} : memref<8x128xf32, #tpu.memory_space<vmem>>, vector<8x128xf32>,
      %cst_36 = arith.constant 0.000000e+00 : f32
      %60 = vector.broadcast %cst_36 : f32 to vector<8x128xf32>
      %c0_37 = arith.constant 0 : index
      %c0_38 = arith.constant 0 : index
      %61 = vector.load %arg12[%c0_37, %c0_38] : memref<8x128xf32, #tpu.memory_space<vmem>>, vector<8x128xf32>
      tpu.vector_store %arg12[%c0_37, %c0_38], %60 {strides = array<i32>} : memref<8x128xf32, #tpu.memory_space<vmem>>, vector<8x128xf32>,
    } else {
    }
    %c0 = arith.constant 0 : index
    %c0_1 = arith.constant 0 : index
    %c0_2 = arith.constant 0 : index
    %c0_3 = arith.constant 0 : index
    %3 = vector.load %arg3[%c0, %c0_1, %c0_2, %c0_3] : memref<1x1x64x3xf32, #tpu.memory_space<vmem>>, vector<1x1x64x3xf32>
    %4 = vector.shape_cast %3 : vector<1x1x64x3xf32> to vector<64x3xf32>
    %c0_4 = arith.constant 0 : index
    %c0_5 = arith.constant 0 : index
    %c0_6 = arith.constant 0 : index
    %5 = vector.load %arg4[%c0_4, %c0_5, %c0_6] : memref<1x3x128xf32, #tpu.memory_space<vmem>>, vector<1x3x128xf32>
    %6 = vector.shape_cast %5 : vector<1x3x128xf32> to vector<3x128xf32>
    %7 = vector.extract_strided_slice %4 {offsets = [0, 0], sizes = [64, 1], strides = [1, 1]} : vector<64x3xf32> to vector<64x1xf32>
    %8 = vector.extract_strided_slice %6 {offsets = [0, 0], sizes = [1, 128], strides = [1, 1]} : vector<3x128xf32> to vector<1x128xf32>
    %9 = vector.broadcast %7 : vector<64x1xf32> to vector<64x128xf32>
    %10 = vector.broadcast %8 : vector<1x128xf32> to vector<64x128xf32>
    %11 = arith.mulf %9, %10 : vector<64x128xf32>
    %12 = vector.extract_strided_slice %4 {offsets = [0, 1], sizes = [64, 1], strides = [1, 1]} : vector<64x3xf32> to vector<64x1xf32>
    %13 = vector.extract_strided_slice %6 {offsets = [1, 0], sizes = [1, 128], strides = [1, 1]} : vector<3x128xf32> to vector<1x128xf32>
    %14 = vector.broadcast %12 : vector<64x1xf32> to vector<64x128xf32>
    %15 = vector.broadcast %13 : vector<1x128xf32> to vector<64x128xf32>
    %16 = arith.mulf %14, %15 : vector<64x128xf32>
    %17 = arith.addf %11, %16 : vector<64x128xf32>
    %18 = vector.extract_strided_slice %4 {offsets = [0, 2], sizes = [64, 1], strides = [1, 1]} : vector<64x3xf32> to vector<64x1xf32>
    %19 = vector.extract_strided_slice %6 {offsets = [2, 0], sizes = [1, 128], strides = [1, 1]} : vector<3x128xf32> to vector<1x128xf32>
    %20 = vector.broadcast %18 : vector<64x1xf32> to vector<64x128xf32>
    %21 = vector.broadcast %19 : vector<1x128xf32> to vector<64x128xf32>
    %22 = arith.mulf %20, %21 : vector<64x128xf32>
    %23 = arith.addf %17, %22 : vector<64x128xf32>
    %c0_7 = arith.constant 0 : index
    %c0_8 = arith.constant 0 : index
    %c0_9 = arith.constant 0 : index
    %24 = vector.load %arg5[%c0_7, %c0_8, %c0_9] : memref<1x1x128xf32, #tpu.memory_space<vmem>>, vector<1x1x128xf32>
    %25 = vector.shape_cast %24 : vector<1x1x128xf32> to vector<1x128xf32>
    %26 = vector.broadcast %25 : vector<1x128xf32> to vector<64x128xf32>
    %27 = arith.addf %23, %26 : vector<64x128xf32>
    %cst = arith.constant 0.000000e+00 : f32
    %28 = vector.broadcast %cst : f32 to vector<64x128xf32>
    %29 = arith.maximumf %27, %28 : vector<64x128xf32>
    %30 = arith.truncf %29 : vector<64x128xf32> to vector<64x128xbf16>
    %c0_10 = arith.constant 0 : index
    %c0_11 = arith.constant 0 : index
    %31 = vector.load %arg6[%c0_10, %c0_11] : memref<128x128xbf16, #tpu.memory_space<vmem>>, vector<128x128xbf16>
    %cst_12 = arith.constant dense<0.000000e+00> : vector<64x128xf32>
    %32 = tpu.matmul %30, %31, %cst_12 {dimension_numbers = #tpu.dot_dimension_numbers<[1], [0], [0], [1], [0, 0, 1, 1], [], []>} : vector<64x128xbf16>, vector<128x128xbf16>, vector<64x128xf32> -> vector<64x128xf32>
    %c0_13 = arith.constant 0 : index
    %c0_14 = arith.constant 0 : index
    %33 = vector.load %arg7[%c0_13, %c0_14] : memref<1x128xf32, #tpu.memory_space<vmem>>, vector<1x128xf32>
    %34 = vector.broadcast %33 : vector<1x128xf32> to vector<64x128xf32>
    %35 = arith.addf %32, %34 : vector<64x128xf32>
    %cst_15 = arith.constant 0.000000e+00 : f32
    %36 = vector.broadcast %cst_15 : f32 to vector<64x128xf32>
    %37 = arith.maximumf %35, %36 : vector<64x128xf32>
    %c0_16 = arith.constant 0 : index
    %c0_17 = arith.constant 0 : index
    %c0_18 = arith.constant 0 : index
    %c0_19 = arith.constant 0 : index
    %38 = vector.load %arg8[%c0_16, %c0_17, %c0_18, %c0_19] : memref<1x1x64x128xf32, #tpu.memory_space<vmem>>, vector<1x1x64x128xf32>
    %39 = vector.shape_cast %38 : vector<1x1x64x128xf32> to vector<64x128xf32>
    %40 = vector.shape_cast %37 : vector<64x128xf32> to vector<1x1x64x128xf32>
    tpu.vector_store %arg8[%c0_16, %c0_17, %c0_18, %c0_19], %40 {strides = array<i32>} : memref<1x1x64x128xf32, #tpu.memory_space<vmem>>, vector<1x1x64x128xf32>,
    %cst_20 = arith.constant 9.99999997E-7 : f32
    %41 = vector.broadcast %cst_20 : f32 to vector<64x128xf32>
    %42 = arith.maximumf %37, %41 : vector<64x128xf32>
    %43 = arith.mulf %42, %42 : vector<64x128xf32>
    %44 = arith.mulf %43, %42 : vector<64x128xf32>
    %c0_21 = arith.constant 0 : index
    %c0_22 = arith.constant 0 : index
    %45 = vector.load %arg11[%c0_21, %c0_22] : memref<8x128xf32, #tpu.memory_space<vmem>>, vector<8x128xf32>
    %46 = vector.shape_cast %44 : vector<64x128xf32> to vector<8x8x128xf32>
    %cst_23 = arith.constant dense<0.000000e+00> : vector<8x128xf32>
    %47 = vector.multi_reduction <add>, %46, %cst_23 [0] : vector<8x8x128xf32> to vector<8x128xf32>
    %48 = arith.addf %45, %47 : vector<8x128xf32>
    %c0_24 = arith.constant 0 : index
    %c0_25 = arith.constant 0 : index
    %49 = vector.load %arg11[%c0_24, %c0_25] : memref<8x128xf32, #tpu.memory_space<vmem>>, vector<8x128xf32>
    tpu.vector_store %arg11[%c0_24, %c0_25], %48 {strides = array<i32>} : memref<8x128xf32, #tpu.memory_space<vmem>>, vector<8x128xf32>,
    %c0_26 = arith.constant 0 : index
    %c0_27 = arith.constant 0 : index
    %50 = vector.load %arg12[%c0_26, %c0_27] : memref<8x128xf32, #tpu.memory_space<vmem>>, vector<8x128xf32>
    %51 = vector.shape_cast %37 : vector<64x128xf32> to vector<8x8x128xf32>
    %cst_28 = arith.constant dense<0.000000e+00> : vector<8x128xf32>
    %52 = vector.multi_reduction <add>, %51, %cst_28 [0] : vector<8x8x128xf32> to vector<8x128xf32>
    %53 = arith.addf %50, %52 : vector<8x128xf32>
    %c0_29 = arith.constant 0 : index
    %c0_30 = arith.constant 0 : index
    %54 = vector.load %arg12[%c0_29, %c0_30] : memref<8x128xf32, #tpu.memory_space<vmem>>, vector<8x128xf32>
    tpu.vector_store %arg12[%c0_29, %c0_30], %53 {strides = array<i32>} : memref<8x128xf32, #tpu.memory_space<vmem>>, vector<8x128xf32>,
    %c0_i32_31 = arith.constant 0 : i32
    %55 = arith.cmpi eq, %arg2, %c0_i32_31 : i32
    %56 = arith.extui %55 : i1 to i32
    %c0_i32_32 = arith.constant 0 : i32
    %57 = arith.cmpi ne, %56, %c0_i32_32 : i32
    scf.if %57 {
      %c0_33 = arith.constant 0 : index
      %c0_34 = arith.constant 0 : index
      %58 = vector.load %arg11[%c0_33, %c0_34] : memref<8x128xf32, #tpu.memory_space<vmem>>, vector<8x128xf32>
      %cst_35 = arith.constant dense<0.000000e+00> : vector<128xf32>
      %59 = vector.multi_reduction <add>, %58, %cst_35 [0] : vector<8x128xf32> to vector<128xf32>
      %60 = vector.shape_cast %59 : vector<128xf32> to vector<1x128xf32>
      %cst_36 = arith.constant 1.562500e-02 : f32
      %61 = vector.broadcast %cst_36 : f32 to vector<1x128xf32>
      %62 = arith.mulf %60, %61 : vector<1x128xf32>
      %cst_37 = arith.constant 0.333333343 : f32
      %63 = vector.broadcast %cst_37 : f32 to vector<1x128xf32>
      %64 = math.powf %62, %63 : vector<1x128xf32>
      %c0_38 = arith.constant 0 : index
      %c0_39 = arith.constant 0 : index
      %c0_40 = arith.constant 0 : index
      %c0_41 = arith.constant 0 : index
      %65 = vector.load %arg9[%c0_38, %c0_39, %c0_40, %c0_41] : memref<1x1x1x128xf32, #tpu.memory_space<vmem>>, vector<1x1x1x128xf32>
      %66 = vector.shape_cast %65 : vector<1x1x1x128xf32> to vector<1x128xf32>
      %67 = vector.shape_cast %64 : vector<1x128xf32> to vector<1x1x1x128xf32>
      tpu.vector_store %arg9[%c0_38, %c0_39, %c0_40, %c0_41], %67 {strides = array<i32>} : memref<1x1x1x128xf32, #tpu.memory_space<vmem>>, vector<1x1x1x128xf32>,
      %c0_42 = arith.constant 0 : index
      %c0_43 = arith.constant 0 : index
      %68 = vector.load %arg12[%c0_42, %c0_43] : memref<8x128xf32, #tpu.memory_space<vmem>>, vector<8x128xf32>
      %cst_44 = arith.constant dense<0.000000e+00> : vector<128xf32>
      %69 = vector.multi_reduction <add>, %68, %cst_44 [0] : vector<8x128xf32> to vector<128xf32>
      %70 = vector.shape_cast %69 : vector<128xf32> to vector<1x128xf32>
      %cst_45 = arith.constant 1.562500e-02 : f32
      %71 = vector.broadcast %cst_45 : f32 to vector<1x128xf32>
      %72 = arith.mulf %70, %71 : vector<1x128xf32>
      %c0_46 = arith.constant 0 : index
      %c0_47 = arith.constant 0 : index
      %c0_48 = arith.constant 0 : index
      %c0_49 = arith.constant 0 : index
      %73 = vector.load %arg10[%c0_46, %c0_47, %c0_48, %c0_49] : memref<1x1x1x128xf32, #tpu.memory_space<vmem>>, vector<1x1x1x128xf32>
      %74 = vector.shape_cast %73 : vector<1x1x1x128xf32> to vector<1x128xf32>
      %75 = vector.shape_cast %72 : vector<1x128xf32> to vector<1x1x1x128xf32>
      tpu.vector_store %arg10[%c0_46, %c0_47, %c0_48, %c0_49], %75 {strides = array<i32>} : memref<1x1x1x128xf32, #tpu.memory_space<vmem>>, vector<1x1x1x128xf32>,
    } else {
    }
    return
  }
  func.func @transform_0(%arg0: i32, %arg1: i32, %arg2: i32) -> (i32, i32, i32, i32) {
    %c0_i32 = arith.constant 0 : i32
    %c0_i32_0 = arith.constant 0 : i32
    return %arg0, %arg1, %arg2, %c0_i32 : i32, i32, i32, i32
  }
  func.func @transform_1(%arg0: i32, %arg1: i32, %arg2: i32) -> (i32, i32, i32) {
    %c0_i32 = arith.constant 0 : i32
    %c0_i32_0 = arith.constant 0 : i32
    %c0_i32_1 = arith.constant 0 : i32
    return %arg0, %c0_i32, %c0_i32_0 : i32, i32, i32
  }
  func.func @transform_2(%arg0: i32, %arg1: i32, %arg2: i32) -> (i32, i32, i32) {
    %c0_i32 = arith.constant 0 : i32
    %c0_i32_0 = arith.constant 0 : i32
    %c0_i32_1 = arith.constant 0 : i32
    return %arg0, %c0_i32, %c0_i32_0 : i32, i32, i32
  }
  func.func @transform_3(%arg0: i32, %arg1: i32, %arg2: i32) -> (i32, i32) {
    %c0_i32 = arith.constant 0 : i32
    %c0_i32_0 = arith.constant 0 : i32
    %c0_i32_1 = arith.constant 0 : i32
    return %c0_i32, %c0_i32_0 : i32, i32
  }
  func.func @transform_4(%arg0: i32, %arg1: i32, %arg2: i32) -> (i32, i32) {
    %c0_i32 = arith.constant 0 : i32
    %c0_i32_0 = arith.constant 0 : i32
    %c0_i32_1 = arith.constant 0 : i32
    return %c0_i32, %c0_i32_0 : i32, i32
  }
  func.func @transform_5(%arg0: i32, %arg1: i32, %arg2: i32) -> (i32, i32, i32, i32) {
    %c0_i32 = arith.constant 0 : i32
    %c0_i32_0 = arith.constant 0 : i32
    return %arg0, %arg1, %arg2, %c0_i32 : i32, i32, i32, i32
  }
  func.func @transform_6(%arg0: i32, %arg1: i32, %arg2: i32) -> (i32, i32, i32, i32) {
    %c0_i32 = arith.constant 0 : i32
    %c0_i32_0 = arith.constant 0 : i32
    %c0_i32_1 = arith.constant 0 : i32
    return %arg0, %arg1, %c0_i32, %c0_i32_0 : i32, i32, i32, i32
  }
  func.func @transform_7(%arg0: i32, %arg1: i32, %arg2: i32) -> (i32, i32, i32, i32) {
    %c0_i32 = arith.constant 0 : i32
    %c0_i32_0 = arith.constant 0 : i32
    %c0_i32_1 = arith.constant 0 : i32
    return %arg0, %arg1, %c0_i32, %c0_i32_0 : i32, i32, i32, i32
  }
}

module attributes {stable_mosaic.version = 11 : i64} {
  func.func @_aff_gem_kernel(%arg0: i32, %arg1: i32, %arg2: memref<1x64x128xf32, #tpu.memory_space<vmem>>, %arg3: memref<1x1x128xf32, #tpu.memory_space<vmem>>, %arg4: memref<128x32xbf16, #tpu.memory_space<vmem>>, %arg5: memref<1x32xf32, #tpu.memory_space<vmem>>, %arg6: memref<32x128xbf16, #tpu.memory_space<vmem>>, %arg7: memref<1x128xf32, #tpu.memory_space<vmem>>, %arg8: memref<1x1x128xf32, #tpu.memory_space<vmem>>, %arg9: memref<8x128xf32, #tpu.memory_space<vmem>>) attributes {dimension_semantics = [#tpu.dimension_semantics<parallel>, #tpu.dimension_semantics<arbitrary>], iteration_bounds = array<i64: 4, 1>, scalar_prefetch = 0 : i64, scratch_operands = 1 : i64, tpu.core_type = #tpu.core_type<tc>, window_params = [{transform_indices = @transform_0, window_bounds = array<i64: 1, 64, 128>}, {transform_indices = @transform_1, window_bounds = array<i64: 1, 1, 128>}, {pipeline_mode = #tpu.pipeline_mode<synchronous>, transform_indices = @transform_2, window_bounds = array<i64: 128, 32>}, {pipeline_mode = #tpu.pipeline_mode<synchronous>, transform_indices = @transform_3, window_bounds = array<i64: 1, 32>}, {pipeline_mode = #tpu.pipeline_mode<synchronous>, transform_indices = @transform_4, window_bounds = array<i64: 32, 128>}, {pipeline_mode = #tpu.pipeline_mode<synchronous>, transform_indices = @transform_5, window_bounds = array<i64: 1, 128>}, {transform_indices = @transform_6, window_bounds = array<i64: 1, 1, 128>}]} {
    %c0_i32 = arith.constant 0 : i32
    %0 = arith.cmpi eq, %arg1, %c0_i32 : i32
    %1 = arith.extui %0 : i1 to i32
    %c0_i32_0 = arith.constant 0 : i32
    %2 = arith.cmpi ne, %1, %c0_i32_0 : i32
    scf.if %2 {
      %cst_28 = arith.constant 0.000000e+00 : f32
      %51 = vector.broadcast %cst_28 : f32 to vector<8x128xf32>
      %c0_29 = arith.constant 0 : index
      %c0_30 = arith.constant 0 : index
      %52 = vector.load %arg9[%c0_29, %c0_30] : memref<8x128xf32, #tpu.memory_space<vmem>>, vector<8x128xf32>
      tpu.vector_store %arg9[%c0_29, %c0_30], %51 {strides = array<i32>} : memref<8x128xf32, #tpu.memory_space<vmem>>, vector<8x128xf32>,
    } else {
    }
    %c0 = arith.constant 0 : index
    %c0_1 = arith.constant 0 : index
    %c0_2 = arith.constant 0 : index
    %3 = vector.load %arg2[%c0, %c0_1, %c0_2] : memref<1x64x128xf32, #tpu.memory_space<vmem>>, vector<1x64x128xf32>
    %4 = vector.shape_cast %3 : vector<1x64x128xf32> to vector<64x128xf32>
    %5 = arith.addf %4, %4 : vector<64x128xf32>
    %6 = arith.truncf %5 : vector<64x128xf32> to vector<64x128xbf16>
    %c0_3 = arith.constant 0 : index
    %c0_4 = arith.constant 0 : index
    %7 = vector.load %arg4[%c0_3, %c0_4] : memref<128x32xbf16, #tpu.memory_space<vmem>>, vector<128x32xbf16>
    %cst = arith.constant dense<0.000000e+00> : vector<64x32xf32>
    %8 = tpu.matmul %6, %7, %cst {dimension_numbers = #tpu.dot_dimension_numbers<[1], [0], [0], [1], [0, 0, 1, 1], [], []>} : vector<64x128xbf16>, vector<128x32xbf16>, vector<64x32xf32> -> vector<64x32xf32>
    %c0_5 = arith.constant 0 : index
    %c0_6 = arith.constant 0 : index
    %9 = vector.load %arg5[%c0_5, %c0_6] : memref<1x32xf32, #tpu.memory_space<vmem>>, vector<1x32xf32>
    %10 = vector.broadcast %9 : vector<1x32xf32> to vector<64x32xf32>
    %11 = arith.addf %8, %10 : vector<64x32xf32>
    %cst_7 = arith.constant 0.000000e+00 : f32
    %12 = vector.broadcast %cst_7 : f32 to vector<64x32xf32>
    %13 = arith.maximumf %11, %12 : vector<64x32xf32>
    %14 = arith.truncf %13 : vector<64x32xf32> to vector<64x32xbf16>
    %c0_8 = arith.constant 0 : index
    %c0_9 = arith.constant 0 : index
    %15 = vector.load %arg6[%c0_8, %c0_9] : memref<32x128xbf16, #tpu.memory_space<vmem>>, vector<32x128xbf16>
    %cst_10 = arith.constant dense<0.000000e+00> : vector<64x128xf32>
    %16 = tpu.matmul %14, %15, %cst_10 {dimension_numbers = #tpu.dot_dimension_numbers<[1], [0], [0], [1], [0, 0, 1, 1], [], []>} : vector<64x32xbf16>, vector<32x128xbf16>, vector<64x128xf32> -> vector<64x128xf32>
    %c0_11 = arith.constant 0 : index
    %c0_12 = arith.constant 0 : index
    %17 = vector.load %arg7[%c0_11, %c0_12] : memref<1x128xf32, #tpu.memory_space<vmem>>, vector<1x128xf32>
    %18 = vector.broadcast %17 : vector<1x128xf32> to vector<64x128xf32>
    %19 = arith.addf %16, %18 : vector<64x128xf32>
    %c0_13 = arith.constant 0 : index
    %c0_14 = arith.constant 0 : index
    %c0_15 = arith.constant 0 : index
    %20 = vector.load %arg3[%c0_13, %c0_14, %c0_15] : memref<1x1x128xf32, #tpu.memory_space<vmem>>, vector<1x1x128xf32>
    %21 = vector.shape_cast %20 : vector<1x1x128xf32> to vector<1x128xf32>
    %22 = vector.broadcast %21 : vector<1x128xf32> to vector<64x128xf32>
    %23 = arith.addf %19, %22 : vector<64x128xf32>
    %24 = arith.negf %23 : vector<64x128xf32>
    %25 = math.exp %24 : vector<64x128xf32>
    %cst_16 = arith.constant 1.000000e+00 : f32
    %26 = vector.broadcast %cst_16 : f32 to vector<64x128xf32>
    %27 = arith.addf %26, %25 : vector<64x128xf32>
    %28 = arith.divf %26, %27 : vector<64x128xf32>
    %cst_17 = arith.constant 2.000000e+00 : f32
    %29 = vector.broadcast %cst_17 : f32 to vector<64x128xf32>
    %30 = arith.mulf %29, %4 : vector<64x128xf32>
    %31 = arith.mulf %30, %28 : vector<64x128xf32>
    %cst_18 = arith.constant 2.000000e+00 : f32
    %32 = vector.broadcast %cst_18 : f32 to vector<64x128xf32>
    %33 = arith.mulf %32, %4 : vector<64x128xf32>
    %cst_19 = arith.constant 1.000000e+00 : f32
    %34 = vector.broadcast %cst_19 : f32 to vector<64x128xf32>
    %35 = arith.subf %34, %28 : vector<64x128xf32>
    %36 = arith.mulf %33, %35 : vector<64x128xf32>
    %37 = arith.addf %31, %36 : vector<64x128xf32>
    %38 = arith.addf %37, %4 : vector<64x128xf32>
    %cst_20 = arith.constant 9.99999997E-7 : f32
    %39 = vector.broadcast %cst_20 : f32 to vector<64x128xf32>
    %40 = arith.maximumf %38, %39 : vector<64x128xf32>
    %41 = arith.mulf %40, %40 : vector<64x128xf32>
    %42 = arith.mulf %41, %40 : vector<64x128xf32>
    %c0_21 = arith.constant 0 : index
    %c0_22 = arith.constant 0 : index
    %43 = vector.load %arg9[%c0_21, %c0_22] : memref<8x128xf32, #tpu.memory_space<vmem>>, vector<8x128xf32>
    %44 = vector.shape_cast %42 : vector<64x128xf32> to vector<8x8x128xf32>
    %cst_23 = arith.constant dense<0.000000e+00> : vector<8x128xf32>
    %45 = vector.multi_reduction <add>, %44, %cst_23 [0] : vector<8x8x128xf32> to vector<8x128xf32>
    %46 = arith.addf %43, %45 : vector<8x128xf32>
    %c0_24 = arith.constant 0 : index
    %c0_25 = arith.constant 0 : index
    %47 = vector.load %arg9[%c0_24, %c0_25] : memref<8x128xf32, #tpu.memory_space<vmem>>, vector<8x128xf32>
    tpu.vector_store %arg9[%c0_24, %c0_25], %46 {strides = array<i32>} : memref<8x128xf32, #tpu.memory_space<vmem>>, vector<8x128xf32>,
    %c0_i32_26 = arith.constant 0 : i32
    %48 = arith.cmpi eq, %arg1, %c0_i32_26 : i32
    %49 = arith.extui %48 : i1 to i32
    %c0_i32_27 = arith.constant 0 : i32
    %50 = arith.cmpi ne, %49, %c0_i32_27 : i32
    scf.if %50 {
      %c0_28 = arith.constant 0 : index
      %c0_29 = arith.constant 0 : index
      %51 = vector.load %arg9[%c0_28, %c0_29] : memref<8x128xf32, #tpu.memory_space<vmem>>, vector<8x128xf32>
      %cst_30 = arith.constant dense<0.000000e+00> : vector<128xf32>
      %52 = vector.multi_reduction <add>, %51, %cst_30 [0] : vector<8x128xf32> to vector<128xf32>
      %53 = vector.shape_cast %52 : vector<128xf32> to vector<1x128xf32>
      %cst_31 = arith.constant 1.562500e-02 : f32
      %54 = vector.broadcast %cst_31 : f32 to vector<1x128xf32>
      %55 = arith.mulf %53, %54 : vector<1x128xf32>
      %cst_32 = arith.constant 0.333333343 : f32
      %56 = vector.broadcast %cst_32 : f32 to vector<1x128xf32>
      %57 = math.powf %55, %56 : vector<1x128xf32>
      %c0_33 = arith.constant 0 : index
      %c0_34 = arith.constant 0 : index
      %c0_35 = arith.constant 0 : index
      %58 = vector.load %arg8[%c0_33, %c0_34, %c0_35] : memref<1x1x128xf32, #tpu.memory_space<vmem>>, vector<1x1x128xf32>
      %59 = vector.shape_cast %58 : vector<1x1x128xf32> to vector<1x128xf32>
      %60 = vector.shape_cast %57 : vector<1x128xf32> to vector<1x1x128xf32>
      tpu.vector_store %arg8[%c0_33, %c0_34, %c0_35], %60 {strides = array<i32>} : memref<1x1x128xf32, #tpu.memory_space<vmem>>, vector<1x1x128xf32>,
    } else {
    }
    return
  }
  func.func @transform_0(%arg0: i32, %arg1: i32) -> (i32, i32, i32) {
    %c0_i32 = arith.constant 0 : i32
    %c0_i32_0 = arith.constant 0 : i32
    return %arg0, %arg1, %c0_i32 : i32, i32, i32
  }
  func.func @transform_1(%arg0: i32, %arg1: i32) -> (i32, i32, i32) {
    %c0_i32 = arith.constant 0 : i32
    %c0_i32_0 = arith.constant 0 : i32
    %c0_i32_1 = arith.constant 0 : i32
    return %arg0, %c0_i32, %c0_i32_0 : i32, i32, i32
  }
  func.func @transform_2(%arg0: i32, %arg1: i32) -> (i32, i32) {
    %c0_i32 = arith.constant 0 : i32
    %c0_i32_0 = arith.constant 0 : i32
    %c0_i32_1 = arith.constant 0 : i32
    return %c0_i32, %c0_i32_0 : i32, i32
  }
  func.func @transform_3(%arg0: i32, %arg1: i32) -> (i32, i32) {
    %c0_i32 = arith.constant 0 : i32
    %c0_i32_0 = arith.constant 0 : i32
    %c0_i32_1 = arith.constant 0 : i32
    return %c0_i32, %c0_i32_0 : i32, i32
  }
  func.func @transform_4(%arg0: i32, %arg1: i32) -> (i32, i32) {
    %c0_i32 = arith.constant 0 : i32
    %c0_i32_0 = arith.constant 0 : i32
    %c0_i32_1 = arith.constant 0 : i32
    return %c0_i32, %c0_i32_0 : i32, i32
  }
  func.func @transform_5(%arg0: i32, %arg1: i32) -> (i32, i32) {
    %c0_i32 = arith.constant 0 : i32
    %c0_i32_0 = arith.constant 0 : i32
    %c0_i32_1 = arith.constant 0 : i32
    return %c0_i32, %c0_i32_0 : i32, i32
  }
  func.func @transform_6(%arg0: i32, %arg1: i32) -> (i32, i32, i32) {
    %c0_i32 = arith.constant 0 : i32
    %c0_i32_0 = arith.constant 0 : i32
    %c0_i32_1 = arith.constant 0 : i32
    return %arg0, %c0_i32, %c0_i32_0 : i32, i32, i32
  }
}

</mosaic_0001>

<bundles_post_ra>
// kernel: network_forward.4
= control target key start
LH: loop header
LB: loop body
LE: loop exit
PB: predicated region body
PF: predicated region fallthrough
CT: control target
= control target key end

     0   :  { %s527_s0 = inlined_call_operand.vmem [shape: f32[4,128], index: 0, kind: input, shape index: {}]   ;;  %s528_s1 = inlined_call_operand.vmem [shape: f32[4,128], index: 1, kind: input, shape index: {}]   ;;  %s529_s2 = inlined_call_operand.vmem [shape: f32[1,128], index: 2, kind: input, shape index: {}]   ;;  %s530_s3 = inlined_call_operand.vmem [shape: f32[1,128], index: 3, kind: input, shape index: {}]   ;;  %s531_s4 = inlined_call_operand.vmem [shape: bf16[128,16], index: 4, kind: input, shape index: {}]   ;;  %s532_s5 = inlined_call_operand.vmem [shape: bf16[128,32], index: 5, kind: input, shape index: {}]   ;;  %s533_s6 = inlined_call_operand.vmem [shape: f32[1,32], index: 6, kind: input, shape index: {}]   ;;  %s534_s7 = inlined_call_operand.vmem [shape: bf16[32,128], index: 7, kind: input, shape index: {}]   ;;  %s535_s8 = inlined_call_operand.vmem [shape: f32[1,128], index: 8, kind: input, shape index: {}]   ;;  %s536_s9 = inlined_call_operand.hbm [shape: f32[4,16], index: 9, kind: output, shape index: {0}]   ;;  %s537_s10 = inlined_call_operand.vmem [shape: f32[4,128], index: 10, kind: output, shape index: {1}]  }
   0x1   :  { %v359_v0 = vld [vmem:[%s532_s5 + $0x38] sm:$0xff]  ;;  %v358_v1 = vld [vmem:[%s532_s5 + $0x30] sm:$0xff]  ;;  %v357_v3 = vld [vmem:[%s532_s5 + $0x28] sm:$0xff] }
   0x2   :  { %198 = vmatpush.bf16.msra.mxu1 %v359_v0  ;;  %v351_v2 = vld [vmem:[%s531_s4 + $0x38] sm:$0xff]  ;;  %v350_v4 = vld [vmem:[%s531_s4 + $0x30] sm:$0xff] }
   0x3   :  { %112 = vmatpush.bf16.msra.mxu0 %v351_v2 }
   0x6   :  { %199 = vmatpush.bf16.msra.mxu1 %v358_v1 }
   0x7   :  { %16 = vsyncpa [#allocation3], 0  ;;  %113 = vmatpush.bf16.msra.mxu0 %v350_v4  ;;  %v349_v5 = vld [vmem:[%s531_s4 + $0x28] sm:$0xff]  ;;  %v356_v6 = vld [vmem:[%s532_s5 + $0x20] sm:$0xff]  ;;  %vm233_vm0 = vcmask 261120   ;;  %vm125_vm1 = vcmask 125952  }
   0x8   :  { %v348_v7 = vld [vmem:[%s531_s4 + $0x20] sm:$0xff]  ;;  %v355_v8 = vld [vmem:[%s532_s5 + $0x18] sm:$0xff]  ;;  %v354_v10 = vld [vmem:[%s532_s5 + $0x10] sm:$0xff] }
   0x9   :  { %v347_v9 = vld [vmem:[%s531_s4 + $0x18] sm:$0xff]  ;;  %v346_v11 = vld [vmem:[%s531_s4 + $0x10] sm:$0xff]  ;;  %v353_v12 = vld [vmem:[%s532_s5 + $0x8] sm:$0xff] }
   0xa   :  { %200 = vmatpush.bf16.msra.mxu1 %v357_v3  ;;  %v127_v13 = vld [vmem:[%s528_s1] sm:$0xf]  ;;  %v345_v15 = vld [vmem:[%s531_s4 + $0x8] sm:$0xff] }
   0xb   :  { %114 = vmatpush.bf16.msra.mxu0 %v349_v5  ;;  %v128_v14 = vmul.f32 2.0, %v127_v13  ;;  %v352_v16 = vld [vmem:[%s532_s5] sm:$0xff]  ;;  %v361_v19 = vld [vmem:[%s534_s7 + $0x8] sm:$0xff] }
   0xc   :  { %v364_v18 = vld [vmem:[%s529_s2] ss:$0 sm:$0xff]  ;;  %243 = vmatpush.bf16.msra.mxu2 %v361_v19 }
   0xd   :  { %v129_v17 = vpack.c.bf16 %v128_v14, %v128_v14  ;;  %v36_v20 = vld [vmem:[%s527_s0] sm:$0xf] }
   0xe   :  { %201 = vmatpush.bf16.msra.mxu1 %v356_v6  ;;  %v41_v21 = vmul.f32 %v364_v18, %v36_v20  ;;  %v365_v22 = vld [vmem:[%s530_s3] ss:$0 sm:$0xff]  ;;  %s393_s3 = smov [#allocation2]  }
   0xf   :  { %115 = vmatpush.bf16.msra.mxu0 %v348_v7  ;;  %v344_v23 = vld [vmem:[%s531_s4] sm:$0xff]  ;;  %s256_s4 = sshll.u32 %s393_s3, 4  ;;  %s257_s4 = int_to_ptr.vmem [resolvable:$true] %s256_s4 }
  0x10   :  { %v46_v24 = vadd.f32 %v365_v22, %v41_v21  ;;  %v360_v25 = vld [vmem:[%s534_s7] sm:$0xff]  ;;  %s258_s7 = sshll.u32 %s536_s9, 4  ;;  %s259_s7 = int_to_ptr.hbm [resolvable:$true] %s258_s7 }
  0x11   :  { %244 = vmatpush.bf16.msra.mxu2 %v360_v25  ;;  %v363_v27 = vld [vmem:[%s533_s6] ss:$0 sm:$0xff] }
  0x12   :  { %202 = vmatpush.bf16.msra.mxu1 %v355_v8  ;;  %v47_v26 = vpack.c.bf16 %v46_v24, %v46_v24  ;;  %v366_v35 = vld [vmem:[%s535_s8] ss:$0 sm:$0xff] }
  0x13   :  { %116 = vmatpush.bf16.msra.mxu0 %v347_v9 }
  0x16   :  { %203 = vmatpush.bf16.msra.mxu1 %v354_v10 }
  0x17   :  { %117 = vmatpush.bf16.msra.mxu0 %v346_v11 }
  0x1a   :  { %204 = vmatpush.bf16.msra.mxu1 %v353_v12 }
  0x1b   :  { %118 = vmatpush.bf16.msra.mxu0 %v345_v15 }
  0x1e   :  { %205 = vmatpush.bf16.msra.mxu1 %v352_v16 }
  0x1f   :  { %119 = vmatpush.bf16.msra.mxu0 %v344_v23 }
  0x21   :  { %206 = vmatmul.bf16.vlgmr.msra.gmra.mxu1 %v129_v17 }
  0x22   :  { %120 = vmatmul.bf16.vlgmr.msra.gmra.mxu0 %v47_v26 }
  0x9e   :  { %v207_v28 = vpop.f32.mrf.mxu1 }
  0x9f   :  { %v208_v29 = vadd.f32 %v363_v27, %v207_v28  ;;  %v121_v33 = vpop.f32.mrf.mxu0 }
  0xa0   :  { %126 = vst.msk [vmem:[#allocation2] sm:$0xf] %vm125_vm1, %v121_v33 }
  0xa1   :  { %v211_v30 = vmax.f32 %v208_v29, 0.0  ;;  %261 = dma.vmem_to_hbm [thread:$0]  %s257_s4, 64, %s259_s7, [#allocation3]  }
  0xa3   :  { %v212_v31 = vpack.c.bf16 %v211_v30, %v211_v30 }
  0xa5   :  { %343 = vmatmul.msk.bf16.vlgmr.msra.gmra.mxu2 %vm233_vm0, %v212_v31 }
  0xa6   :  { %v209_v32 = vpop.f32.mrf.mxu1 }
  0xa7   :  { %v123_v34 = vpop.f32.mrf.mxu0 }
 0x128   :  { %v246_v36 = vpop.f32.mrf.mxu2 }
 0x129   :  { %v247_v37 = vadd.f32 %v366_v35, %v246_v36 }
 0x12b   :  { %250 = vst [vmem:[%s537_s10] sm:$0xf] %v247_v37 }
 0x130   :  { %v248_v38 = vpop.f32.mrf.mxu2 }
 0x131   :  { %391 = dma.done.wait [#allocation3], 64  }
 0x132   :  { %392 = vsyncadd [#allocation3], 4294967232 }
 0x133   :  { %270 = vsyncpa [#allocation3], 1 }

// kernel: network_forward.5
= control target key start
LH: loop header
LB: loop body
LE: loop exit
PB: predicated region body
PF: predicated region fallthrough
CT: control target
= control target key end

     0   :  { %11 = vsyncpa [#allocation4], 0  ;;  %s1482_s0 = inlined_call_operand.vmem [shape: f32[4,64,128], index: 0, kind: input, shape index: {}]   ;;  %s1483_s1 = inlined_call_operand.vmem [shape: f32[4,1,128], index: 1, kind: input, shape index: {}]   ;;  %s1484_s2 = inlined_call_operand.vmem [shape: bf16[128,32], index: 2, kind: input, shape index: {}]   ;;  %s1485_s3 = inlined_call_operand.vmem [shape: f32[1,32], index: 3, kind: input, shape index: {}]   ;;  %s1486_s4 = inlined_call_operand.vmem [shape: bf16[32,128], index: 4, kind: input, shape index: {}]   ;;  %s1487_s5 = inlined_call_operand.vmem [shape: f32[1,128], index: 5, kind: input, shape index: {}]   ;;  %s1488_s6 = inlined_call_operand.hbm [shape: f32[4,1,128], index: 6, kind: output, shape index: {}]  }
   0x1   :  { %13 = vsyncpa [#allocation4 + $0x1], 0  ;;  %s1153_s21 = smov 0   ;;  %s1155_s22 = smov 0  }
   0x2   :  { %s1157_s23 = smov 0   ;;  %s1159_s24 = smov 0  }
   0x3   :  { %s1161_s25 = smov 0   ;;  %s1163_s26 = smov 0  }
   0x4 LB: > { %s838_s27 = sadd.s32 4294967295, %s1116_s26   ;;  %s839_s28 = sadd.s32 4294967294, %s1116_s26   ;;  %s1116_s26 = sphi %s1163_s26, %s19_s26   ;;  %s1112_s25 = sphi %s1161_s25, %s1509_s25   ;;  %s1108_s24 = sphi %s1159_s24, %s1508_s24   ;;  %s1104_s23 = sphi %s1157_s23, %s1507_s23   ;;  %s1100_s22 = sphi %s1155_s22, %s1506_s22   ;;  %s1096_s21 = sphi %s1153_s21, %s1505_s21  }
   0x5   : > { %s31_s29 = sadd.s32 1, %s1112_s25  ;;  %s176_s30 = sadd.s32 1, %s1104_s23 }
   0x6   : > { %p33_p0 = scmp.ge.s32.totalorder %s31_s29, 4  ;;  %p186_p1 = scmp.ne.s32.totalorder %s1104_s23, %s1100_s22 }
   0x7   : > { %p187_p2 = scmp.eq.s32.totalorder %s838_s27, 3  ;;  %p192_p3 = scmp.ne.s32.totalorder %s1100_s22, %s1096_s21 }
   0x8   : > { %s1511_s29 = smov (%p33_p0, %s31_s29), 0  ;;  %p193_p5 = scmp.eq.s32.totalorder %s839_s28, 3 }
   0x9   : > { %p1193_p4 = por %p187_p2, %p186_p1  ;;  %s173_s8 = ssub.s32 %s1112_s25, %s1511_s29 }
   0xa   : > { %p842_p6 = scmp.ge.s32.totalorder %s1116_s26, 1  ;;  %p174_p7 = scmp.eq.s32.totalorder %s173_s8, 0 }
   0xb   : > { %p1200_p8 = por %p193_p5, %p192_p3  ;;  %p242_p9 = scmp.lt.s32.totalorder %s1116_s26, 5 }
   0xc   : > { %s1206_s10 = scalar_select %p174_p7, %s1104_s23, %s176_s30  }
   0xd   : > { %p243_p10 = pnand %p842_p6, %p242_p9 }
   0xe   : > { %p279_p11 = scmp.lt.s32.totalorder (!%p243_p10), %s1108_s24, 3  ;;  %s756_s28 = scalar_lea.hbm (!%p243_p10), %s1488_s6, %s1108_s24 }
   0xf   : > { %246 = sbr.rel (%p243_p10) target bundleno = 484 (0x1e4), region = 44 }
  0x14   : > { %v907_v0 = vld [vmem:[%s1484_s2 + $0x38] sm:$0xff]  ;;  %v906_v1 = vld [vmem:[%s1484_s2 + $0x30] sm:$0xff]  ;;  %s1216_s15 = scalar_select %p279_p11, %s1108_s24, 3  ;;  %v905_v2 = vld [vmem:[%s1484_s2 + $0x28] sm:$0xff]  ;;  %vm446_vm0 = vcmask 261120  }
  0x15   : > { %385 = vmatpush.bf16.msra.mxu0 %v907_v0  ;;  %910 = vmatpush.bf16.msra.mxu2 %v907_v0  ;;  %v904_v3 = vld [vmem:[%s1484_s2 + $0x20] sm:$0xff]  ;;  %v903_v4 = vld [vmem:[%s1484_s2 + $0x18] sm:$0xff]  ;;  %v902_v5 = vld [vmem:[%s1484_s2 + $0x10] sm:$0xff] }
  0x16   : > { %s290_s18 = scalar_lea.vmem %s1483_s1, %s1216_s15  ;;  %s899_s11 = sshll.u32 %s1216_s15, 6  ;;  %v901_v6 = vld [vmem:[%s1484_s2 + $0x8] sm:$0xff]  ;;  %v900_v15 = vld [vmem:[%s1484_s2] sm:$0xff] }
  0x17   : > { %s286_s17 = scalar_lea.vmem %s1482_s0, %s899_s11  ;;  %v909_v28 = vld [vmem:[%s1486_s4 + $0x8] sm:$0xff]  ;;  %v908_v29 = vld [vmem:[%s1486_s4] sm:$0xff]  ;;  %s276_s15 = sand.u32 1, %s1100_s22  }
  0x18   : > { %v1241_v7 = vld [vmem:[%s286_s17] sm:$0xff]  ;;  %v1243_v8 = vld [vmem:[%s286_s17 + $0x8] sm:$0xff]  ;;  %v1260_v18 = vld [vmem:[%s286_s17 + $0x10] sm:$0xff]  ;;  %465 = vmatpush.bf16.msra.mxu1 %v909_v28  ;;  %918 = vmatpush.bf16.msra.mxu3 %v909_v28  ;;  %s277_s30 = scalar_lea.vmem [#allocation3], %s276_s15  ;;  %s760_s11 = sshll.u32 %s756_s28, 4  ;;  %s761_s11 = int_to_ptr.hbm [resolvable:$true] %s760_s11 }
  0x19   : > { %386 = vmatpush.bf16.msra.mxu0 %v906_v1  ;;  %911 = vmatpush.bf16.msra.mxu2 %v906_v1  ;;  %v1245_v9 = vld [vmem:[%s286_s17 + $0x20] sm:$0xff]  ;;  %v1247_v10 = vld [vmem:[%s286_s17 + $0x28] sm:$0xff]  ;;  %v305_v11 = vadd.f32 %v1241_v7, %v1241_v7  ;;  %v306_v12 = vadd.f32 %v1243_v8, %v1243_v8  ;;  %v1262_v19 = vld [vmem:[%s286_s17 + $0x18] sm:$0xff]  ;;  %v307_v22 = vadd.f32 %v1260_v18, %v1260_v18  ;;  %s758_s8 = sshll.u32 %s277_s30, 4  ;;  %s748_s24 = scalar_lea.sflag [#allocation4], %s276_s15  ;;  %s759_s8 = int_to_ptr.vmem [resolvable:$true] %s758_s8 }
  0x1a   : > { %v309_v13 = vadd.f32 %v1245_v9, %v1245_v9  ;;  %v310_v14 = vadd.f32 %v1247_v10, %v1247_v10  ;;  %v1264_v20 = vld [vmem:[%s286_s17 + $0x30] sm:$0xff]  ;;  %v1266_v21 = vld [vmem:[%s286_s17 + $0x38] sm:$0xff]  ;;  %v308_v23 = vadd.f32 %v1262_v19, %v1262_v19  ;;  %v1000_v31 = vld [vmem:[%s1485_s3] ss:$0 sm:$0xff]  ;;  %s1052_s12 = sshra.s32 %s761_s11, 4  ;;  %s1058_s17 = scalar_lea.hbm %s1488_s6, 4  ;;  %s1053_s12 = int_to_ptr.hbm [resolvable:$true] %s1052_s12 }
  0x1b   : > { %v313_v16 = vpack.c.bf16 %v306_v12, %v305_v11  ;;  %v311_v24 = vadd.f32 %v1264_v20, %v1264_v20  ;;  %v312_v25 = vadd.f32 %v1266_v21, %v1266_v21  ;;  %v1292_v60 = vld [vmem:[%s1487_s5] ss:$0 sm:$0xff]  ;;  %s1054_s13 = scalar_lea.hbm %s1053_s12, 1  ;;  %p1059_p1 = scmp.lt.s32.totalorder %s1053_s12, %s1488_s6 }
  0x1c   : > { %v315_v17 = vpack.c.bf16 %v310_v14, %v309_v13  ;;  %v314_v26 = vpack.c.bf16 %v308_v23, %v307_v22  ;;  %466 = vmatpush.bf16.msra.mxu1 %v908_v29  ;;  %919 = vmatpush.bf16.msra.mxu3 %v908_v29  ;;  %v1299_v62 = vld [vmem:[%s290_s18] ss:$0 sm:$0xff]  ;;  %p1055_p12 = scmp.ne.s32.totalorder %s1053_s12, %s1054_s13  ;;  %p1060_p2 = scmp.lt.s32.totalorder %s1058_s17, %s1054_s13 }
  0x1d   : > { %387 = vmatpush.bf16.msra.mxu0 %v905_v2  ;;  %912 = vmatpush.bf16.msra.mxu2 %v905_v2  ;;  %v316_v27 = vpack.c.bf16 %v312_v25, %v311_v24 }
  0x1e   : > { %p1056_p13 = pnand %p1055_p12, %p1193_p4  ;;  %p1061_p3 = por %p1060_p2, %p1059_p1 }
  0x20   : > { %p1057_p0 = pneg %p1056_p13 }
  0x21   : > { %388 = vmatpush.bf16.msra.mxu0 %v904_v3  ;;  %913 = vmatpush.bf16.msra.mxu2 %v904_v3 }
  0x22   : > { %p1062_p5 = pnand %p1061_p3, %p1057_p0 }
  0x25   : > { %389 = vmatpush.bf16.msra.mxu0 %v903_v4  ;;  %914 = vmatpush.bf16.msra.mxu2 %v903_v4 }
  0x29   : > { %390 = vmatpush.bf16.msra.mxu0 %v902_v5  ;;  %915 = vmatpush.bf16.msra.mxu2 %v902_v5 }
  0x2d   : > { %391 = vmatpush.bf16.msra.mxu0 %v901_v6  ;;  %916 = vmatpush.bf16.msra.mxu2 %v901_v6 }
  0x31   : > { %392 = vmatpush.bf16.msra.mxu0 %v900_v15  ;;  %917 = vmatpush.bf16.msra.mxu2 %v900_v15 }
  0x34   : > { %393 = vmatmul.bf16.vlgmr.msra.gmra.mxu0 %v313_v16  ;;  %403 = vmatmul.bf16.vlgmr.msra.gmra.mxu2 %v315_v17 }
  0x44   : > { %398 = vmatmul.bf16.gmra.mxu0 %v314_v26  ;;  %408 = vmatmul.bf16.gmra.mxu2 %v316_v27 }
  0xb1   : > { %v394_v30 = vpop.f32.mrf.mxu0 }
  0xb2   : > { %v395_v32 = vadd.f32 %v1000_v31, %v394_v30 }
  0xb4   : > { %v414_v35 = vmax.f32 %v395_v32, 0.0 }
  0xb7   : > { %v404_v39 = vpop.f32.mrf.mxu2 }
  0xb8   : > { %v405_v47 = vadd.f32 %v1000_v31, %v404_v39 }
  0xb9   : > { %v396_v33 = vpop.f32.mrf.mxu0 }
  0xba   : > { %v397_v34 = vadd.f32 %v1000_v31, %v396_v33  ;;  %v418_v50 = vmax.f32 %v405_v47, 0.0 }
  0xbc   : > { %v415_v36 = vmax.f32 %v397_v34, 0.0 }
  0xbe   : > { %v422_v37 = vpack.c.bf16 %v415_v36, %v414_v35 }
  0xbf   : > { %v406_v46 = vpop.f32.mrf.mxu2 }
  0xc0   : > { %885 = vmatmul.msk.bf16.vlgmr.msra.gmra.mxu1 %vm446_vm0, %v422_v37  ;;  %v407_v48 = vadd.f32 %v1000_v31, %v406_v46 }
  0xc1   : > { %v399_v38 = vpop.f32.mrf.mxu0 }
  0xc2   : > { %v400_v40 = vadd.f32 %v1000_v31, %v399_v38  ;;  %v419_v51 = vmax.f32 %v407_v48, 0.0 }
  0xc4   : > { %v416_v43 = vmax.f32 %v400_v40, 0.0  ;;  %v424_v52 = vpack.c.bf16 %v419_v51, %v418_v50 }
  0xc7   : > { %v409_v49 = vpop.f32.mrf.mxu2 }
  0xc8   : > { %v410_v54 = vadd.f32 %v1000_v31, %v409_v49 }
  0xc9   : > { %v401_v41 = vpop.f32.mrf.mxu0 }
  0xca   : > { %v402_v42 = vadd.f32 %v1000_v31, %v401_v41  ;;  %v420_v56 = vmax.f32 %v410_v54, 0.0 }
  0xcc   : > { %v417_v44 = vmax.f32 %v402_v42, 0.0 }
  0xce   : > { %v423_v45 = vpack.c.bf16 %v417_v44, %v416_v43 }
  0xcf   : > { %v411_v53 = vpop.f32.mrf.mxu2 }
  0xd0   : > { %886 = vmatmul.msk.bf16.vlgmr.msra.gmra.mxu3 %vm446_vm0, %v423_v45  ;;  %v412_v55 = vadd.f32 %v1000_v31, %v411_v53 }
  0xd2   : > { %v421_v57 = vmax.f32 %v412_v55, 0.0 }
  0xd4   : > { %v425_v58 = vpack.c.bf16 %v421_v57, %v420_v56 }
  0xe0   : > { %887 = vmatmul.msk.bf16.gmra.mxu3 %vm446_vm0, %v424_v52 }
  0xf0   : > { %888 = vmatmul.msk.bf16.gmra.mxu3 %vm446_vm0, %v425_v58 }
 0x13d   : > { %v468_v59 = vpop.f32.mrf.mxu1 }
 0x13e   : > { %v469_v63 = vadd.f32 %v1292_v60, %v468_v59 }
 0x140   : > { %v492_v1 = vadd.f32 %v1299_v62, %v469_v63 }
 0x142   : > { %v889_v3 = vmul.f32 -1.442695, %v492_v1 }
 0x144   : > { %1002 = vpow2.f32 %v889_v3 }
 0x145   : > { %v470_v61 = vpop.f32.mrf.mxu1 }
 0x146   : > { %v471_v0 = vadd.f32 %v1292_v60, %v470_v61 }
 0x148   : > { %v493_v2 = vadd.f32 %v1299_v62, %v471_v0 }
 0x14a   : > { %v890_v4 = vmul.f32 -1.442695, %v493_v2  ;;  %v1003_v13 = vpop.eup %1002  ;;  %v653_v2 = vmul.f32 2.0, %v1243_v8 }
 0x14b   : > { %v524_v16 = vadd.f32 1.0, %v1003_v13 }
 0x14c   : > { %1004 = vpow2.f32 %v890_v4 }
 0x14d   : > { %v541_v53 = vand.u32 2147483647, %v524_v16  ;;  %v543_v54 = vand.u32 2147483648, %v524_v16  ;;  %vm537_vm3 = vweird.f32 %v524_v16 }
 0x14f   : > { %vm1350_vm5 = vcmp.eq.f32.partialorder %v541_v53, 8.507059e+37 }
 0x152   : > { %v1005_v14 = vpop.eup %1004 }
 0x153   : > { %v473_v5 = vpop.f32.mrf.mxu3  ;;  %v525_v22 = vadd.f32 1.0, %v1005_v14 }
 0x154   : > { %v474_v6 = vadd.f32 %v1292_v60, %v473_v5 }
 0x155   : > { %v556_v56 = vand.u32 2147483647, %v525_v22  ;;  %v558_v57 = vand.u32 2147483648, %v525_v22  ;;  %vm552_vm6 = vweird.f32 %v525_v22 }
 0x156   : > { %v494_v11 = vadd.f32 %v1299_v62, %v474_v6  ;;  %v544_v6 = vor.u32 1.1754944e-38, %v543_v54 }
 0x157   : > { %vm1359_vm8 = vcmp.eq.f32.partialorder %v556_v56, 8.507059e+37  ;;  %v559_v13 = vor.u32 1.1754944e-38, %v558_v57 }
 0x158   : > { %v891_v12 = vmul.f32 -1.442695, %v494_v11 }
 0x15a   : > { %1006 = vpow2.f32 %v891_v12 }
 0x15b   : > { %v475_v15 = vpop.f32.mrf.mxu3  ;;  %1008 = vrcp.f32 %v524_v16 }
 0x15c   : > { %v476_v17 = vadd.f32 %v1292_v60, %v475_v15  ;;  %1010 = vrcp.f32 %v525_v22 }
 0x15e   : > { %v495_v23 = vadd.f32 %v1299_v62, %v476_v17 }
 0x160   : > { %v1007_v24 = vpop.eup %1006  ;;  %v892_v25 = vmul.f32 -1.442695, %v495_v23 }
 0x161   : > { %v1309_v26 = vadd.f32 1.0, %v1007_v24  ;;  %v1312_v29 = vpop.eup %1008 }
 0x162   : > { %1012 = vpow2.f32 %v892_v25  ;;  %v1315_v31 = vpop.eup %1010  ;;  %v533_v35 = vmul.f32 %v1312_v29, %v524_v16  ;;  %vm538_vm1 = vweird.f32 %v1312_v29 }
 0x163   : > { %v478_v27 = vpop.f32.mrf.mxu3  ;;  %1014 = vrcp.f32 %v1309_v26  ;;  %v548_v36 = vmul.f32 %v1315_v31, %v525_v22  ;;  %vm553_vm2 = vweird.f32 %v1315_v31  ;;  %vm1346_vm4 = vmor %vm537_vm3, %vm538_vm1  ;;  %v571_v22 = vand.u32 2147483647, %v1309_v26 }
 0x164   : > { %v479_v28 = vadd.f32 %v1292_v60, %v478_v27  ;;  %v534_v41 = vsub.f32 1.0, %v533_v35  ;;  %vm1355_vm7 = vmor %vm552_vm6, %vm553_vm2  ;;  %v573_v25 = vand.u32 2147483648, %v1309_v26  ;;  %vm567_vm10 = vweird.f32 %v1309_v26 }
 0x165   : > { %v549_v42 = vsub.f32 1.0, %v548_v36  ;;  %vm572_vm14 = vcmp.eq.f32.partialorder %v571_v22, 8.507059e+37  ;;  %v657_v36 = vmul.f32 2.0, %v1247_v10 }
 0x166   : > { %v496_v30 = vadd.f32 %v1299_v62, %v479_v28  ;;  %v535_v48 = vmul.f32 %v1312_v29, %v534_v41 }
 0x167   : > { %v550_v49 = vmul.f32 %v1315_v31, %v549_v42 }
 0x168   : > { %v1013_v32 = vpop.eup %1012  ;;  %v893_v33 = vmul.f32 -1.442695, %v496_v30  ;;  %v536_v59 = vadd.f32 %v1312_v29, %v535_v48 }
 0x169   : > { %v1318_v34 = vadd.f32 1.0, %v1013_v32  ;;  %v1324_v39 = vpop.eup %1014  ;;  %v551_v61 = vadd.f32 %v1315_v31, %v550_v49 }
 0x16a   : > { %v563_v43 = vmul.f32 %v1324_v39, %v1309_v26  ;;  %v540_v16 = vsel %vm1346_vm4, %v1312_v29, %v536_v59  ;;  %vm568_vm9 = vweird.f32 %v1324_v39 }
 0x16b   : > { %1016 = vrcp.f32 %v1318_v34  ;;  %v480_v37 = vpop.f32.mrf.mxu3  ;;  %v555_v17 = vsel %vm1355_vm7, %v1315_v31, %v551_v61  ;;  %v586_v31 = vand.u32 2147483647, %v1318_v34  ;;  %v588_v32 = vand.u32 2147483648, %v1318_v34  ;;  %vm1386_vm12 = vmor %vm567_vm10, %vm568_vm9 }
 0x16c   : > { %1018 = vpow2.f32 %v893_v33  ;;  %v481_v38 = vadd.f32 %v1292_v60, %v480_v37  ;;  %v564_v52 = vsub.f32 1.0, %v563_v43  ;;  %v560_v30 = vsel %vm1359_vm8, %v559_v13, %v555_v17 }
 0x16d   : > { %v545_v35 = vsel %vm1350_vm5, %v544_v6, %v540_v16  ;;  %vm582_vm13 = vweird.f32 %v1318_v34  ;;  %v669_v42 = vsub.f32 1.0, %v560_v30  ;;  %vm587_vm1 = vcmp.eq.f32.partialorder %v586_v31, 8.507059e+37 }
 0x16e   : > { %v497_v40 = vadd.f32 %v1299_v62, %v481_v38  ;;  %v565_v63 = vmul.f32 %v1324_v39, %v564_v52  ;;  %v574_v38 = vor.u32 1.1754944e-38, %v573_v25  ;;  %v654_v52 = vmul.f32 2.0, %v1260_v18 }
 0x16f   : > { %v661_v56 = vmul.f32 %v653_v2, %v560_v30  ;;  %v655_v6 = vmul.f32 2.0, %v1262_v19 }
 0x170   : > { %v894_v44 = vmul.f32 -1.442695, %v497_v40  ;;  %v566_v24 = vadd.f32 %v1324_v39, %v565_v63 }
 0x171   : > { %v1329_v45 = vpop.eup %1016 }
 0x172   : > { %v1019_v46 = vpop.eup %1018  ;;  %v578_v47 = vmul.f32 %v1329_v45, %v1318_v34  ;;  %1020 = vpow2.f32 %v894_v44  ;;  %vm583_vm11 = vweird.f32 %v1329_v45  ;;  %v570_v37 = vsel %vm1386_vm12, %v1324_v39, %v566_v24 }
 0x173   : > { %v1335_v50 = vadd.f32 1.0, %v1019_v46  ;;  %v483_v51 = vpop.f32.mrf.mxu3  ;;  %vm1395_vm15 = vmor %vm582_vm13, %vm583_vm11 }
 0x174   : > { %v579_v55 = vsub.f32 1.0, %v578_v47  ;;  %v484_v58 = vadd.f32 %v1292_v60, %v483_v51  ;;  %v575_v47 = vsel %vm572_vm14, %v574_v38, %v570_v37  ;;  %v652_v51 = vmul.f32 2.0, %v1241_v7 }
 0x175   : > { %1022 = vrcp.f32 %v1335_v50  ;;  %v603_v39 = vand.u32 2147483648, %v1335_v50  ;;  %vm597_vm2 = vweird.f32 %v1335_v50  ;;  %v601_v48 = vand.u32 2147483647, %v1335_v50 }
 0x176   : > { %v498_v0 = vadd.f32 %v1299_v62, %v484_v58  ;;  %v580_v5 = vmul.f32 %v1329_v45, %v579_v55  ;;  %v668_v55 = vsub.f32 1.0, %v545_v35  ;;  %v670_v58 = vsub.f32 1.0, %v575_v47 }
 0x177   : > { %v604_v59 = vor.u32 1.1754944e-38, %v603_v39  ;;  %vm602_vm4 = vcmp.eq.f32.partialorder %v601_v48, 8.507059e+37  ;;  %v660_v16 = vmul.f32 %v652_v51, %v545_v35  ;;  %v662_v24 = vmul.f32 %v654_v52, %v575_v47 }
 0x178   : > { %v1021_v1 = vpop.eup %1020  ;;  %v895_v23 = vmul.f32 -1.442695, %v498_v0  ;;  %v581_v29 = vadd.f32 %v1329_v45, %v580_v5  ;;  %v676_v11 = vmul.f32 %v668_v55, %v652_v51  ;;  %v678_v12 = vmul.f32 %v670_v58, %v654_v52 }
 0x179   : > { %v1363_v14 = vadd.f32 1.0, %v1021_v1  ;;  %v658_v51 = vmul.f32 2.0, %v1264_v20 }
 0x17a   : > { %v585_v43 = vsel %vm1395_vm15, %v1329_v45, %v581_v29  ;;  %v684_v29 = vadd.f32 %v676_v11, %v660_v16 }
 0x17b   : > { %v1023_v15 = vpop.eup %1022  ;;  %v485_v28 = vpop.f32.mrf.mxu3  ;;  %1024 = vrcp.f32 %v1363_v14  ;;  %v618_v0 = vand.u32 2147483648, %v1363_v14  ;;  %v616_v5 = vand.u32 2147483647, %v1363_v14  ;;  %vm612_vm6 = vweird.f32 %v1363_v14 }
 0x17c   : > { %v593_v27 = vmul.f32 %v1023_v15, %v1335_v50  ;;  %1026 = vpow2.f32 %v895_v23  ;;  %v486_v26 = vadd.f32 %v1292_v60, %v485_v28  ;;  %vm598_vm0 = vweird.f32 %v1023_v15 }
 0x17d   : > { %v589_v60 = vor.u32 1.1754944e-38, %v588_v32  ;;  %vm1408_vm3 = vmor %vm597_vm2, %vm598_vm0  ;;  %v677_v50 = vmul.f32 %v669_v42, %v653_v2  ;;  %v619_v23 = vor.u32 1.1754944e-38, %v618_v0  ;;  %vm617_vm8 = vcmp.eq.f32.partialorder %v616_v5, 8.507059e+37 }
 0x17e   : > { %v594_v33 = vsub.f32 1.0, %v593_v27  ;;  %v499_v34 = vadd.f32 %v1299_v62, %v486_v26  ;;  %v656_v28 = vmul.f32 2.0, %v1245_v9  ;;  %v692_v40 = vadd.f32 %v684_v29, %v1241_v7 }
 0x17f   : > { %v590_v45 = vsel %vm587_vm1, %v589_v60, %v585_v43  ;;  %v685_v2 = vadd.f32 %v677_v50, %v661_v56  ;;  %v659_v0 = vmul.f32 2.0, %v1266_v21 }
 0x180   : > { %v595_v41 = vmul.f32 %v1023_v15, %v594_v33  ;;  %v896_v49 = vmul.f32 -1.442695, %v499_v34  ;;  %v671_v63 = vsub.f32 1.0, %v590_v45  ;;  %v663_v30 = vmul.f32 %v655_v6, %v590_v45 }
 0x181   : > { %v1025_v46 = vpop.eup %1024  ;;  %v693_v32 = vadd.f32 %v685_v2, %v1243_v8  ;;  %v686_v33 = vadd.f32 %v678_v12, %v662_v24  ;;  %v700_v7 = vmax.f32 %v692_v40, 1e-06 }
 0x182   : > { %v596_v44 = vadd.f32 %v1023_v15, %v595_v41  ;;  %v608_v62 = vmul.f32 %v1025_v46, %v1363_v14  ;;  %v1027_v54 = vpop.eup %1026  ;;  %1028 = vpow2.f32 %v896_v49  ;;  %vm613_vm5 = vweird.f32 %v1025_v46 }
 0x183   : > { %v1416_v1 = vadd.f32 1.0, %v1027_v54  ;;  %v679_v17 = vmul.f32 %v671_v63, %v655_v6  ;;  %vm614_vm7 = vmor %vm612_vm6, %vm613_vm5  ;;  %v701_v43 = vmax.f32 %v693_v32, 1e-06  ;;  %v694_v34 = vadd.f32 %v686_v33, %v1260_v18 }
 0x184   : > { %v600_v57 = vsel %vm1408_vm3, %v1023_v15, %v596_v44  ;;  %v609_v61 = vsub.f32 1.0, %v608_v62 }
 0x185   : > { %v605_v3 = vsel %vm602_vm4, %v604_v59, %v600_v57  ;;  %1030 = vrcp.f32 %v1416_v1  ;;  %v687_v26 = vadd.f32 %v679_v17, %v663_v30  ;;  %v631_v49 = vand.u32 2147483647, %v1416_v1 }
 0x186   : > { %v610_v4 = vmul.f32 %v1025_v46, %v609_v61  ;;  %v672_v22 = vsub.f32 1.0, %v605_v3  ;;  %v664_v41 = vmul.f32 %v656_v28, %v605_v3  ;;  %v709_v53 = vmul.f32 %v701_v43, %v701_v43 }
 0x187   : > { %v695_v8 = vadd.f32 %v687_v26, %v1262_v19  ;;  %v702_v18 = vmax.f32 %v694_v34, 1e-06  ;;  %vm627_vm10 = vweird.f32 %v1416_v1  ;;  %vm632_vm12 = vcmp.eq.f32.partialorder %v631_v49, 8.507059e+37 }
 0x188   : > { %v611_v13 = vadd.f32 %v1025_v46, %v610_v4  ;;  %v1029_v15 = vpop.eup %1028  ;;  %v680_v37 = vmul.f32 %v672_v22, %v656_v28  ;;  %v717_v6 = vmul.f32 %v709_v53, %v701_v43 }
 0x189   : > { %v1422_v27 = vadd.f32 1.0, %v1029_v15  ;;  %v703_v19 = vmax.f32 %v695_v8, 1e-06  ;;  %v710_v4 = vmul.f32 %v702_v18, %v702_v18 }
 0x18a   : > { %v615_v25 = vsel %vm614_vm7, %v1025_v46, %v611_v13  ;;  %v688_v44 = vadd.f32 %v680_v37, %v664_v41  ;;  %v633_v46 = vand.u32 2147483648, %v1416_v1 }
 0x18b   : > { %v620_v31 = vsel %vm617_vm8, %v619_v23, %v615_v25  ;;  %1032 = vrcp.f32 %v1422_v27  ;;  %v1031_v35 = vpop.eup %1030  ;;  %v646_v50 = vand.u32 2147483647, %v1422_v27  ;;  %v648_v58 = vand.u32 2147483648, %v1422_v27 }
 0x18c   : > { %v673_v14 = vsub.f32 1.0, %v620_v31  ;;  %v623_v38 = vmul.f32 %v1031_v35, %v1416_v1  ;;  %v665_v39 = vmul.f32 %v657_v36, %v620_v31  ;;  %vm628_vm9 = vweird.f32 %v1031_v35 }
 0x18d   : > { %v696_v54 = vadd.f32 %v688_v44, %v1245_v9  ;;  %vm629_vm11 = vmor %vm627_vm10, %vm628_vm9  ;;  %v634_v55 = vor.u32 1.1754944e-38, %v633_v46  ;;  %v708_v1 = vmul.f32 %v700_v7, %v700_v7  ;;  %vm642_vm14 = vweird.f32 %v1422_v27 }
 0x18e   : > { %v681_v42 = vmul.f32 %v673_v14, %v657_v36  ;;  %v624_v60 = vsub.f32 1.0, %v623_v38  ;;  %v649_v12 = vor.u32 1.1754944e-38, %v648_v58  ;;  %v711_v13 = vmul.f32 %v703_v19, %v703_v19 }
 0x18f   : > { %v704_v9 = vmax.f32 %v696_v54, 1e-06  ;;  %vm647_vm0 = vcmp.eq.f32.partialorder %v646_v50, 8.507059e+37  ;;  %v716_v16 = vmul.f32 %v708_v1, %v700_v7  ;;  %v718_v23 = vmul.f32 %v710_v4, %v702_v18 }
 0x190   : > { %v625_v48 = vmul.f32 %v1031_v35, %v624_v60  ;;  %v689_v52 = vadd.f32 %v681_v42, %v665_v39  ;;  %v719_v30 = vmul.f32 %v711_v13, %v703_v19 }
 0x191   : > { %v1033_v47 = vpop.eup %1032  ;;  %v712_v24 = vmul.f32 %v704_v9, %v704_v9  ;;  %v725_v28 = vadd.f32 %v717_v6, %v716_v16 }
 0x192   : > { %v638_v45 = vmul.f32 %v1033_v47, %v1422_v27  ;;  %v626_v62 = vadd.f32 %v1031_v35, %v625_v48  ;;  %v697_v59 = vadd.f32 %v689_v52, %v1247_v10  ;;  %vm643_vm13 = vweird.f32 %v1033_v47 }
 0x193   : > { %vm644_vm15 = vmor %vm642_vm14, %vm643_vm13  ;;  %v726_v14 = vadd.f32 %v725_v28, %v718_v23 }
 0x194   : > { %v639_v56 = vsub.f32 1.0, %v638_v45  ;;  %v630_v57 = vsel %vm629_vm11, %v1031_v35, %v626_v62  ;;  %v705_v15 = vmax.f32 %v697_v59, 1e-06  ;;  %v720_v35 = vmul.f32 %v712_v24, %v704_v9 }
 0x195   : > { %v635_v61 = vsel %vm632_vm12, %v634_v55, %v630_v57  ;;  %v727_v37 = vadd.f32 %v726_v14, %v719_v30 }
 0x196   : > { %v640_v63 = vmul.f32 %v1033_v47, %v639_v56  ;;  %v674_v3 = vsub.f32 1.0, %v635_v61  ;;  %v666_v11 = vmul.f32 %v658_v51, %v635_v61  ;;  %v713_v27 = vmul.f32 %v705_v15, %v705_v15 }
 0x197   : > { %v728_v41 = vadd.f32 %v727_v37, %v720_v35 }
 0x198   : > { %v641_v5 = vadd.f32 %v1033_v47, %v640_v63  ;;  %v682_v2 = vmul.f32 %v674_v3, %v658_v51  ;;  %v721_v38 = vmul.f32 %v713_v27, %v705_v15 }
 0x19a   : > { %v645_v10 = vsel %vm644_vm15, %v1033_v47, %v641_v5  ;;  %v690_v17 = vadd.f32 %v682_v2, %v666_v11  ;;  %v729_v34 = vadd.f32 %v728_v41, %v721_v38 }
 0x19b   : > { %v650_v22 = vsel %vm647_vm0, %v649_v12, %v645_v10 }
 0x19c   : > { %v675_v25 = vsub.f32 1.0, %v650_v22  ;;  %v698_v29 = vadd.f32 %v690_v17, %v1264_v20  ;;  %v667_v31 = vmul.f32 %v659_v0, %v650_v22 }
 0x19e   : > { %v683_v32 = vmul.f32 %v675_v25, %v659_v0  ;;  %v706_v33 = vmax.f32 %v698_v29, 1e-06 }
 0x1a0   : > { %v691_v36 = vadd.f32 %v683_v32, %v667_v31  ;;  %v714_v26 = vmul.f32 %v706_v33, %v706_v33 }
 0x1a2   : > { %v699_v40 = vadd.f32 %v691_v36, %v1266_v21  ;;  %v722_v42 = vmul.f32 %v714_v26, %v706_v33 }
 0x1a4   : > { %v707_v43 = vmax.f32 %v699_v40, 1e-06  ;;  %v730_v8 = vadd.f32 %v729_v34, %v722_v42 }
 0x1a6   : > { %v715_v60 = vmul.f32 %v707_v43, %v707_v43 }
 0x1a8   : > { %v723_v20 = vmul.f32 %v715_v60, %v707_v43 }
 0x1aa   : > { %v731_v44 = vadd.f32 %v730_v8, %v723_v20 }
 0x1ac   : > { %v738_v39 = vrot.slane %v731_v44, 4 }
 0x1ae   : > { %v739_v46 = vadd.f32 %v738_v39, %v731_v44 }
 0x1b0   : > { %v740_v47 = vrot.slane %v739_v46, 2 }
 0x1b2   : > { %v741_v48 = vadd.f32 %v740_v47, %v739_v46 }
 0x1b4   : > { %v742_v49 = vrot.slane %v741_v48, 1 }
 0x1b6   : > { %v743_v51 = vadd.f32 %v742_v49, %v741_v48 }
 0x1b8   : > { %v744_v7 = vmul.f32 0.015625, %v743_v51 }
 0x1ba   : > { %v922_v52 = vand.u32 2147483647, %v744_v7  ;;  %v939_v58 = vand.u32 2147483648, %v744_v7  ;;  %vm921_vm3 = vcmp.lt.f32.partialorder %v744_v7, 0.0  ;;  %vm920_vm4 = vcmp.eq.f32.partialorder %v744_v7, 0.0 }
 0x1bc   : > { %1034 = vlog2.f32 %v922_v52  ;;  %vm936_vm1 = vweird.f32 %v922_v52  ;;  %vm938_vm2 = vcmp.eq.f32.partialorder %v922_v52, 0.0  ;;  %vm923_vm5 = vcmp.eq.f32.partialorder %v922_v52, inf }
 0x1c2   : > { %v1035_v21 = vpop.eup %1034 }
 0x1c3   : > { %v926_v45 = vmul.f32 -0.33333334, %v1035_v21 }
 0x1c5   : > { %1036 = vpow2.f32 %v926_v45 }
 0x1cb   : > { %v1037_v53 = vpop.eup %1036 }
 0x1cc   : > { %v928_v18 = vmul.f32 %v1037_v53, %v1037_v53 }
 0x1ce   : > { %v929_v62 = vmul.f32 %v928_v18, %v922_v52 }
 0x1d0   : > { %v930_v19 = vmul.f32 %v929_v62, %v928_v18 }
 0x1d2   : > { %v931_v54 = vsub.f32 %v930_v19, %v1037_v53 }
 0x1d4   : > { %v932_v55 = vmul.f32 -0.33333334, %v931_v54 }
 0x1d6   : > { %v933_v56 = vadd.f32 %v1037_v53, %v932_v55 }
 0x1d8   : > { %v934_v57 = vmul.f32 %v933_v56, %v744_v7 }
 0x1da   : > { %v935_v50 = vmul.f32 %v934_v57, %v933_v56 }
 0x1dc   : > { %v937_v59 = vsel %vm936_vm1, %v744_v7, %v935_v50 }
 0x1dd   : > { %v940_v61 = vsel %vm938_vm2, %v939_v58, %v937_v59 }
 0x1de   : > { %v941_v63 = vsel %vm921_vm3, nan, %v940_v61 }
 0x1df   : > { %v942_v0 = vsel %vm920_vm4, 0.0, %v941_v63 }
 0x1e0   : > { %v943_v1 = vsel %vm923_vm5, inf, %v942_v0 }
 0x1e1   : > { %746 = vst [vmem:[%s277_s30] sm:$0x1] %v943_v1 }
 0x1e2   : > { %1065 = shalt.err (!%p1062_p5)
}
 0x1e3   : > { %944 = dma.vmem_to_hbm [thread:$0]  (%p1193_p4), %s759_s8, 16, %s761_s11, %s748_s24  }
 0x1e4 PF: > { %p950_p6 = scmp.ge.s32.totalorder %s1116_s26, 2  ;;  %s772_s15 = sand.u32 1, %s1096_s21  }
 0x1e5   : > { %s773_s18 = scalar_lea.sflag [#allocation4], %s772_s15 }
 0x1e6   : > { %p947_p7 = pnand %p950_p6, %p1200_p8 }
 0x1e8   : > { %p948_p9 = pneg %p947_p7 }
 0x1ea   : > { %1091 = dma.done.wait (%p948_p9), %s773_s18, 16  }
 0x1eb   : > { %1093 = vsyncadd (%p948_p9), %s773_s18, 4294967280  ;;  %s19_s26 = sadd.s32 1, %s1116_s26   ;;  %s1505_s21 = smov %s1100_s22 }
 0x1ec   : > { %p16_p10 = scmp.ge.s32.totalorder %s19_s26, 6   ;;  %s1506_s22 = smov %s1104_s23 }
 0x1ed   : > { %s1507_s23 = smov %s1206_s10  ;;  %s1508_s24 = smov %s1112_s25 }
 0x1ee   : > { %s1509_s25 = smov %s1511_s29  ;;  %18 = sbr.rel (!%p16_p10) target bundleno = 4 (0x4), region = 90 }
 0x1f3   :  { %778 = vsyncpa [#allocation4], 1 }
 0x1f4   :  { %780 = vsyncpa [#allocation4 + $0x1], 1 }

// kernel: network_forward.3
= control target key start
LH: loop header
LB: loop body
LE: loop exit
PB: predicated region body
PF: predicated region fallthrough
CT: control target
= control target key end

     0   :  { %s1252_s24 = smov 0   ;;  %s1254_s25 = smov 0   ;;  %s1421_s0 = inlined_call_operand.vmem [shape: f32[2,2,64,3], index: 0, kind: input, shape index: {}]   ;;  %s1422_s1 = inlined_call_operand.vmem [shape: f32[2,3,128], index: 1, kind: input, shape index: {}]   ;;  %s1423_s2 = inlined_call_operand.vmem [shape: f32[2,1,128], index: 2, kind: input, shape index: {}]   ;;  %s1424_s3 = inlined_call_operand.vmem [shape: bf16[128,128], index: 3, kind: input, shape index: {}]   ;;  %s1425_s4 = inlined_call_operand.vmem [shape: f32[1,128], index: 4, kind: input, shape index: {}]   ;;  %s1426_s5 = inlined_call_operand.vmem [shape: f32[2,2,64,128], index: 5, kind: output, shape index: {0}]   ;;  %s1427_s6 = inlined_call_operand.vmem [shape: f32[2,2,1,128], index: 6, kind: output, shape index: {1}]   ;;  %s1428_s7 = inlined_call_operand.vmem [shape: f32[2,2,1,128], index: 7, kind: output, shape index: {2}]  }
   0x1   :  { %s1256_s26 = smov 0   ;;  %s1258_s27 = smov 0  }
   0x2   :  { %s1260_s28 = smov 0  }
   0x3 LB: > { %s33_s29 = sadd.s32 1, %s1199_s26  ;;  %s37_s30 = sadd.s32 1, %s1203_s27  ;;  %s1207_s28 = sphi %s1260_s28, %s18_s28   ;;  %s1203_s27 = sphi %s1258_s27, %s1432_s27   ;;  %s1199_s26 = sphi %s1256_s26, %s1431_s26   ;;  %s1195_s25 = sphi %s1254_s25, %s1430_s25   ;;  %s1191_s24 = sphi %s1252_s24, %s1429_s24  }
   0x4   : > { %p35_p0 = scmp.ge.s32.totalorder %s33_s29, 2  ;;  %p1004_p1 = scmp.ge.s32.totalorder %s1207_s28, 1 }
   0x5   : > { %p299_p2 = scmp.lt.s32.totalorder %s1207_s28, 5 }
   0x6   : > { %s1434_s29 = smov (%p35_p0, %s33_s29), 0  ;;  %s1436_s30 = smov (!%p35_p0, %s37_s30), %s1203_s27 }
   0x7   : > { %p300_p3 = pnand %p1004_p1, %p299_p2  ;;  %p39_p4 = scmp.ge.s32.totalorder %s1436_s30, 2 }
   0x8   : > { %p369_p5 = scmp.lt.s32.totalorder (!%p300_p3), %s1195_s25, 1  ;;  %p371_p6 = scmp.lt.s32.totalorder (!%p300_p3), %s1191_s24, 1 }
   0x9   : > { %s1438_s30 = smov (%p39_p4, %s1436_s30), 0  ;;  %303 = sbr.rel (%p300_p3) target bundleno = 422 (0x1a6), region = 40 }
   0xe   : > { %v1209_v0 = vmov 1   ;;  %v1210_v1 = vmov 0   ;;  %s1440_s25 = smov (!%p369_p5, %s1195_s25), 1  ;;  %s1442_s24 = smov (!%p371_p6, %s1191_s24), 1  ;;  %v1211_v7 = vmov 2   ;;  %v1055_v11 = vld [vmem:[%s1424_s3 + $0x38] sm:$0xff] }
   0xf   : > { %1148 = vset.pattern.permute.xlu1 %v1209_v0  ;;  %1149 = vset.pattern.permute.xlu2 %v1210_v1  ;;  %s1006_s8 = sshll.u32 %s1440_s25, 4  ;;  %s388_s11 = scalar_lea.vmem %s1423_s2, %s1440_s25  ;;  %v1054_v12 = vld [vmem:[%s1424_s3 + $0x30] sm:$0xff]  ;;  %v1053_v13 = vld [vmem:[%s1424_s3 + $0x28] sm:$0xff]  ;;  %v1052_v15 = vld [vmem:[%s1424_s3 + $0x20] sm:$0xff] }
  0x10   : > { %1147 = vset.pattern.permute.xlu0 %v1210_v1  ;;  %s1005_s12 = sshll.u32 %s1442_s24, 3  ;;  %671 = vmatpush.bf16.msra.mxu0 %v1055_v11  ;;  %v1051_v16 = vld [vmem:[%s1424_s3 + $0x18] sm:$0xff]  ;;  %v1050_v17 = vld [vmem:[%s1424_s3 + $0x10] sm:$0xff]  ;;  %v1049_v19 = vld [vmem:[%s1424_s3 + $0x8] sm:$0xff]  ;;  %s1008_s21 = sshll.u32 %s1440_s25, 2 }
  0x11   : > { %s1292_s13 = sadd.s32 %s1006_s8, %s1005_s12  ;;  %1057 = vmatpush.bf16.msra.mxu2 %v1055_v11  ;;  %1056 = vmatpush.bf16.msra.mxu1 %v1055_v11  ;;  %v1048_v21 = vld [vmem:[%s1424_s3] sm:$0xff]  ;;  %s385_s8 = scalar_lea.vmem %s1422_s1, %s1008_s21 }
  0x12   : > { %s1007_s14 = sshll.u32 %s1292_s13, 3  ;;  %1058 = vmatpush.bf16.msra.mxu3 %v1055_v11  ;;  %v431_v26 = vld [vmem:[%s385_s8] sm:$0x7]  ;;  %s1012_s13 = sshll.u32 %s1440_s25, 1 }
  0x13   : > { %s380_s17 = scalar_lea.vmem %s1421_s0, %s1007_s14  ;;  %v1330_v27 = vperm.slane %v431_v26, 0  ;;  %v1332_v28 = vperm.slane %v431_v26, 1  ;;  %v1334_v31 = vperm.slane %v431_v26, 2  ;;  %v1346_v41 = vld [vmem:[%s388_s11] ss:$0 sm:$0xff] }
  0x14   : > { %v427_v2 = vld [vmem:[%s380_s17 + $0x20] sm:$0xff]  ;;  %v428_v4 = vld [vmem:[%s380_s17 + $0x28] sm:$0xff]  ;;  %v426_v6 = vld [vmem:[%s380_s17 + $0x18] sm:$0xff]  ;;  %672 = vmatpush.bf16.msra.mxu0 %v1054_v12 }
  0x15   : > { %v423_v3 = vld [vmem:[%s380_s17] sm:$0xff]  ;;  %454 = vperm.xlu2 %1149, %v427_v2   ;;  %v424_v5 = vld [vmem:[%s380_s17 + $0x8] sm:$0xff]  ;;  %v429_v8 = vld [vmem:[%s380_s17 + $0x30] sm:$0xff]  ;;  %1060 = vmatpush.bf16.msra.mxu2 %v1054_v12 }
  0x16   : > { %482 = vperm.xlu1 %1148, %v423_v3   ;;  %434 = vperm.xlu0 %1147, %v423_v3   ;;  %v425_v9 = vld [vmem:[%s380_s17 + $0x10] sm:$0xff]  ;;  %v430_v10 = vld [vmem:[%s380_s17 + $0x38] sm:$0xff]  ;;  %s1384_s17 = scalar_lea.vmem %s1426_s5, %s1007_s14  ;;  %s1396_s14 = sadd.s32 %s1012_s13, %s1442_s24 }
  0x17   : > { %1059 = vmatpush.bf16.msra.mxu1 %v1054_v12  ;;  %1061 = vmatpush.bf16.msra.mxu3 %v1054_v12  ;;  %s416_s20 = scalar_lea.vmem %s1428_s7, %s1396_s14  ;;  %s409_s21 = scalar_lea.vmem %s1427_s6, %s1396_s14 }
  0x18   : > { %673 = vmatpush.bf16.msra.mxu0 %v1053_v13 }
  0x19   : > { %1063 = vmatpush.bf16.msra.mxu2 %v1053_v13 }
  0x1b   : > { %1062 = vmatpush.bf16.msra.mxu1 %v1053_v13  ;;  %1064 = vmatpush.bf16.msra.mxu3 %v1053_v13 }
  0x1c   : > { %674 = vmatpush.bf16.msra.mxu0 %v1052_v15 }
  0x1d   : > { %459 = vperm.xlu2 %1149, %v428_v4   ;;  %1066 = vmatpush.bf16.msra.mxu2 %v1052_v15 }
  0x1e   : > { %486 = vperm.xlu1 %1148, %v424_v5   ;;  %439 = vperm.xlu0 %1147, %v424_v5  }
  0x1f   : > { %1065 = vmatpush.bf16.msra.mxu1 %v1052_v15  ;;  %1067 = vmatpush.bf16.msra.mxu3 %v1052_v15 }
  0x20   : > { %675 = vmatpush.bf16.msra.mxu0 %v1051_v16 }
  0x21   : > { %1069 = vmatpush.bf16.msra.mxu2 %v1051_v16 }
  0x23   : > { %1068 = vmatpush.bf16.msra.mxu1 %v1051_v16  ;;  %1070 = vmatpush.bf16.msra.mxu3 %v1051_v16 }
  0x24   : > { %676 = vmatpush.bf16.msra.mxu0 %v1050_v17 }
  0x25   : > { %1150 = vset.pattern.permute.xlu2 %v1211_v7  ;;  %1072 = vmatpush.bf16.msra.mxu2 %v1050_v17 }
  0x26   : > { %502 = vperm.xlu1 %1148, %v428_v4   ;;  %449 = vperm.xlu0 %1147, %v426_v6  }
  0x27   : > { %531 = vperm.xlu2 %1150, %v423_v3   ;;  %1071 = vmatpush.bf16.msra.mxu1 %v1050_v17 }
  0x28   : > { %1073 = vmatpush.bf16.msra.mxu3 %v1050_v17  ;;  %677 = vmatpush.bf16.msra.mxu0 %v1049_v19 }
  0x29   : > { %1075 = vmatpush.bf16.msra.mxu2 %v1049_v19 }
  0x2b   : > { %1074 = vmatpush.bf16.msra.mxu1 %v1049_v19 }
  0x2c   : > { %1076 = vmatpush.bf16.msra.mxu3 %v1049_v19  ;;  %678 = vmatpush.bf16.msra.mxu0 %v1048_v21 }
  0x2d   : > { %1078 = vmatpush.bf16.msra.mxu2 %v1048_v21 }
  0x2e   : > { %1151 = vset.pattern.permute.xlu1 %v1211_v7  ;;  %464 = vperm.xlu0 %1147, %v429_v8  }
  0x2f   : > { %1152 = vset.pattern.permute.xlu2 %v1210_v1  ;;  %535 = vperm.xlu1 %1151, %v424_v5  }
  0x30   : > { %444 = vperm.xlu2 %1152, %v425_v9   ;;  %1077 = vmatpush.bf16.msra.mxu1 %v1048_v21 }
  0x31   : > { %1079 = vmatpush.bf16.msra.mxu3 %v1048_v21 }
  0x36   : > { %1157 = vset.pattern.permute.xlu0 %v1209_v0 }
  0x37   : > { %1153 = vset.pattern.permute.xlu1 %v1209_v0  ;;  %498 = vperm.xlu0 %1157, %v427_v2  }
  0x38   : > { %1154 = vset.pattern.permute.xlu2 %v1209_v0  ;;  %490 = vperm.xlu1 %1153, %v425_v9  }
  0x39   : > { %494 = vperm.xlu2 %1154, %v426_v6  }
  0x3f   : > { %510 = vperm.xlu0 %1157, %v430_v10  }
  0x40   : > { %1155 = vset.pattern.permute.xlu1 %v1211_v7 }
  0x41   : > { %1156 = vset.pattern.permute.xlu2 %v1211_v7  ;;  %547 = vperm.xlu1 %1155, %v427_v2  }
  0x42   : > { %551 = vperm.xlu2 %1156, %v428_v4  }
  0x47   : > { %1162 = vset.pattern.permute.xlu0 %v1211_v7 }
  0x49   : > { %1158 = vset.pattern.permute.xlu1 %v1210_v1 }
  0x4a   : > { %1159 = vset.pattern.permute.xlu2 %v1209_v0  ;;  %469 = vperm.xlu1 %1158, %v430_v10  }
  0x4b   : > { %506 = vperm.xlu2 %1159, %v429_v8  }
  0x52   : > { %1160 = vset.pattern.permute.xlu1 %v1211_v7 }
  0x53   : > { %1161 = vset.pattern.permute.xlu2 %v1211_v7  ;;  %539 = vperm.xlu1 %1160, %v425_v9  }
  0x54   : > { %543 = vperm.xlu2 %1161, %v426_v6  }
  0x5b   : > { %555 = vperm.xlu1 %1160, %v429_v8  }
  0x5c   : > { %559 = vperm.xlu2 %1161, %v430_v10  }
  0x6f   : > { %v1309_v14 = vpop.permute.xlu2 %454 }
  0x70   : > { %v477_v60 = vmul.f32 %v1330_v27, %v1309_v14 }
  0x77   : > { %v460_v18 = vpop.permute.xlu2 %459 }
  0x78   : > { %v478_v56 = vmul.f32 %v1330_v27, %v460_v18 }
  0x81   : > { %v532_v23 = vpop.permute.xlu2 %531 }
  0x82   : > { %v563_v35 = vmul.f32 %v1334_v31, %v532_v23 }
  0x88   : > { %v483_v20 = vpop.permute.xlu1 %482  ;;  %v435_v22 = vpop.permute.xlu0 %434 }
  0x89   : > { %v514_v32 = vmul.f32 %v1332_v28, %v483_v20  ;;  %v473_v33 = vmul.f32 %v1330_v27, %v435_v22 }
  0x8a   : > { %v445_v29 = vpop.permute.xlu2 %444 }
  0x8b   : > { %v522_v36 = vadd.f32 %v514_v32, %v473_v33  ;;  %v475_v16 = vmul.f32 %v1330_v27, %v445_v29 }
  0x8d   : > { %v571_v40 = vadd.f32 %v563_v35, %v522_v36 }
  0x8f   : > { %v583_v47 = vadd.f32 %v1346_v41, %v571_v40 }
  0x90   : > { %v487_v24 = vpop.permute.xlu1 %486  ;;  %v440_v25 = vpop.permute.xlu0 %439 }
  0x91   : > { %v515_v37 = vmul.f32 %v1332_v28, %v487_v24  ;;  %v474_v38 = vmul.f32 %v1330_v27, %v440_v25  ;;  %v591_v49 = vmax.f32 %v583_v47, 0.0 }
  0x93   : > { %v495_v39 = vpop.permute.xlu2 %494  ;;  %v523_v43 = vadd.f32 %v515_v37, %v474_v38 }
  0x94   : > { %v517_v10 = vmul.f32 %v1332_v28, %v495_v39 }
  0x98   : > { %v503_v30 = vpop.permute.xlu1 %502  ;;  %v450_v34 = vpop.permute.xlu0 %449 }
  0x99   : > { %v519_v54 = vmul.f32 %v1332_v28, %v503_v30  ;;  %v476_v11 = vmul.f32 %v1330_v27, %v450_v34 }
  0x9b   : > { %v527_v58 = vadd.f32 %v519_v54, %v478_v56  ;;  %v525_v14 = vadd.f32 %v517_v10, %v476_v11 }
  0x9c   : > { %v552_v51 = vpop.permute.xlu2 %551 }
  0x9d   : > { %v568_v57 = vmul.f32 %v1334_v31, %v552_v51 }
  0x9f   : > { %v576_v61 = vadd.f32 %v568_v57, %v527_v58 }
  0xa0   : > { %v465_v45 = vpop.permute.xlu0 %464 }
  0xa1   : > { %v536_v42 = vpop.permute.xlu1 %535  ;;  %v588_v3 = vadd.f32 %v1346_v41, %v576_v61  ;;  %v479_v33 = vmul.f32 %v1330_v27, %v465_v45 }
  0xa2   : > { %v564_v44 = vmul.f32 %v1334_v31, %v536_v42 }
  0xa3   : > { %v596_v6 = vmax.f32 %v588_v3, 0.0 }
  0xa4   : > { %v572_v46 = vadd.f32 %v564_v44, %v523_v43 }
  0xa5   : > { %v507_v62 = vpop.permute.xlu2 %506 }
  0xa6   : > { %v584_v48 = vadd.f32 %v1346_v41, %v572_v46  ;;  %v520_v32 = vmul.f32 %v1332_v28, %v507_v62 }
  0xa8   : > { %v592_v50 = vmax.f32 %v584_v48, 0.0  ;;  %v528_v38 = vadd.f32 %v520_v32, %v479_v33 }
  0xa9   : > { %v499_v55 = vpop.permute.xlu0 %498 }
  0xaa   : > { %v491_v52 = vpop.permute.xlu1 %490  ;;  %v599_v53 = vpack.c.bf16 %v592_v50, %v591_v49  ;;  %v518_v59 = vmul.f32 %v1332_v28, %v499_v55 }
  0xab   : > { %v516_v15 = vmul.f32 %v1332_v28, %v491_v52 }
  0xac   : > { %679 = vmatmul.bf16.vlgmr.msra.gmra.mxu0 %v599_v53  ;;  %v526_v0 = vadd.f32 %v518_v59, %v477_v60 }
  0xad   : > { %v524_v22 = vadd.f32 %v516_v15, %v475_v16 }
  0xae   : > { %v544_v9 = vpop.permute.xlu2 %543 }
  0xaf   : > { %v566_v12 = vmul.f32 %v1334_v31, %v544_v9 }
  0xb1   : > { %v511_v13 = vpop.permute.xlu0 %510  ;;  %v574_v17 = vadd.f32 %v566_v12, %v525_v14 }
  0xb2   : > { %v521_v19 = vmul.f32 %v1332_v28, %v511_v13 }
  0xb3   : > { %v548_v63 = vpop.permute.xlu1 %547  ;;  %v586_v30 = vadd.f32 %v1346_v41, %v574_v17 }
  0xb4   : > { %v567_v1 = vmul.f32 %v1334_v31, %v548_v63 }
  0xb5   : > { %v594_v36 = vmax.f32 %v586_v30, 0.0 }
  0xb6   : > { %v575_v2 = vadd.f32 %v567_v1, %v526_v0  ;;  %v560_v20 = vpop.permute.xlu2 %559 }
  0xb7   : > { %v570_v25 = vmul.f32 %v1334_v31, %v560_v20 }
  0xb8   : > { %v587_v4 = vadd.f32 %v1346_v41, %v575_v2 }
  0xba   : > { %v595_v5 = vmax.f32 %v587_v4, 0.0 }
  0xbc   : > { %v470_v7 = vpop.permute.xlu1 %469  ;;  %v601_v8 = vpack.c.bf16 %v596_v6, %v595_v5 }
  0xbd   : > { %v480_v18 = vmul.f32 %v1330_v27, %v470_v7  ;;  %v1164_v27 = vld [vmem:[%s1425_s4] ss:$0 sm:$0xff] }
  0xbe   : > { %689 = vmatmul.bf16.vlgmr.msra.gmra.mxu2 %v601_v8 }
  0xbf   : > { %v529_v24 = vadd.f32 %v521_v19, %v480_v18 }
  0xc1   : > { %v578_v34 = vadd.f32 %v570_v25, %v529_v24 }
  0xc3   : > { %v590_v43 = vadd.f32 %v1346_v41, %v578_v34 }
  0xc5   : > { %v540_v21 = vpop.permute.xlu1 %539  ;;  %v598_v46 = vmax.f32 %v590_v43, 0.0 }
  0xc6   : > { %v565_v23 = vmul.f32 %v1334_v31, %v540_v21 }
  0xc8   : > { %v573_v26 = vadd.f32 %v565_v23, %v524_v22 }
  0xca   : > { %v585_v29 = vadd.f32 %v1346_v41, %v573_v26 }
  0xcc   : > { %v593_v35 = vmax.f32 %v585_v29, 0.0 }
  0xcd   : > { %v556_v37 = vpop.permute.xlu1 %555 }
  0xce   : > { %v569_v39 = vmul.f32 %v1334_v31, %v556_v37  ;;  %v600_v40 = vpack.c.bf16 %v594_v36, %v593_v35 }
  0xd0   : > { %v577_v42 = vadd.f32 %v569_v39, %v528_v38  ;;  %684 = vmatmul.bf16.vlgmr.msra.gmra.mxu1 %v600_v40 }
  0xd2   : > { %v589_v44 = vadd.f32 %v1346_v41, %v577_v42 }
  0xd4   : > { %v597_v28 = vmax.f32 %v589_v44, 0.0 }
  0xd6   : > { %v602_v47 = vpack.c.bf16 %v598_v46, %v597_v28 }
  0xd8   : > { %694 = vmatmul.bf16.vlgmr.msra.gmra.mxu3 %v602_v47 }
 0x129   : > { %v680_v45 = vpop.f32.mrf.mxu0 }
 0x12a   : > { %v681_v48 = vadd.f32 %v1164_v27, %v680_v45 }
 0x12c   : > { %v700_v31 = vmax.f32 %v681_v48, 0.0 }
 0x12e   : > { %708 = vst [vmem:[%s1384_s17] sm:$0xff] %v700_v31  ;;  %v716_v61 = vmax.f32 %v700_v31, 1e-06 }
 0x130   : > { %v724_v1 = vmul.f32 %v716_v61, %v716_v61 }
 0x131   : > { %v682_v41 = vpop.f32.mrf.mxu0 }
 0x132   : > { %v683_v49 = vadd.f32 %v1164_v27, %v682_v41  ;;  %v732_v9 = vmul.f32 %v724_v1, %v716_v61 }
 0x134   : > { %v701_v50 = vmax.f32 %v683_v49, 0.0 }
 0x136   : > { %709 = vst [vmem:[%s1384_s17 + $0x8] sm:$0xff] %v701_v50  ;;  %v717_v59 = vmax.f32 %v701_v50, 1e-06  ;;  %v751_v2 = vadd.f32 %v701_v50, %v700_v31 }
 0x138   : > { %v725_v63 = vmul.f32 %v717_v59, %v717_v59 }
 0x13a   : > { %v733_v5 = vmul.f32 %v725_v63, %v717_v59 }
 0x13c   : > { %v741_v14 = vadd.f32 %v733_v5, %v732_v9 }
 0x141   : > { %v690_v51 = vpop.f32.mrf.mxu2 }
 0x142   : > { %v691_v52 = vadd.f32 %v1164_v27, %v690_v51 }
 0x144   : > { %v704_v53 = vmax.f32 %v691_v52, 0.0 }
 0x146   : > { %712 = vst [vmem:[%s1384_s17 + $0x20] sm:$0xff] %v704_v53  ;;  %v720_v8 = vmax.f32 %v704_v53, 1e-06 }
 0x148   : > { %v728_v17 = vmul.f32 %v720_v8, %v720_v8 }
 0x149   : > { %v692_v54 = vpop.f32.mrf.mxu2 }
 0x14a   : > { %v693_v55 = vadd.f32 %v1164_v27, %v692_v54  ;;  %v736_v25 = vmul.f32 %v728_v17, %v720_v8 }
 0x14c   : > { %v705_v56 = vmax.f32 %v693_v55, 0.0 }
 0x14d   : > { %v685_v57 = vpop.f32.mrf.mxu1 }
 0x14e   : > { %713 = vst [vmem:[%s1384_s17 + $0x28] sm:$0xff] %v705_v56  ;;  %v686_v58 = vadd.f32 %v1164_v27, %v685_v57  ;;  %v721_v18 = vmax.f32 %v705_v56, 1e-06 }
 0x150   : > { %v702_v60 = vmax.f32 %v686_v58, 0.0  ;;  %v729_v26 = vmul.f32 %v721_v18, %v721_v18 }
 0x152   : > { %710 = vst [vmem:[%s1384_s17 + $0x10] sm:$0xff] %v702_v60  ;;  %v718_v62 = vmax.f32 %v702_v60, 1e-06  ;;  %v752_v6 = vadd.f32 %v751_v2, %v702_v60  ;;  %v737_v35 = vmul.f32 %v729_v26, %v721_v18 }
 0x154   : > { %v726_v3 = vmul.f32 %v718_v62, %v718_v62 }
 0x155   : > { %v687_v0 = vpop.f32.mrf.mxu1 }
 0x156   : > { %v688_v4 = vadd.f32 %v1164_v27, %v687_v0  ;;  %v734_v10 = vmul.f32 %v726_v3, %v718_v62 }
 0x158   : > { %v703_v7 = vmax.f32 %v688_v4, 0.0  ;;  %v742_v19 = vadd.f32 %v741_v14, %v734_v10 }
 0x15a   : > { %711 = vst [vmem:[%s1384_s17 + $0x18] sm:$0xff] %v703_v7  ;;  %v719_v11 = vmax.f32 %v703_v7, 1e-06  ;;  %v753_v12 = vadd.f32 %v752_v6, %v703_v7 }
 0x15b   : > { %v695_v13 = vpop.f32.mrf.mxu3 }
 0x15c   : > { %v727_v15 = vmul.f32 %v719_v11, %v719_v11  ;;  %v696_v16 = vadd.f32 %v1164_v27, %v695_v13  ;;  %v754_v21 = vadd.f32 %v753_v12, %v704_v53 }
 0x15e   : > { %v735_v20 = vmul.f32 %v727_v15, %v719_v11  ;;  %v706_v22 = vmax.f32 %v696_v16, 0.0  ;;  %v755_v30 = vadd.f32 %v754_v21, %v705_v56 }
 0x160   : > { %v743_v23 = vadd.f32 %v742_v19, %v735_v20  ;;  %714 = vst [vmem:[%s1384_s17 + $0x30] sm:$0xff] %v706_v22  ;;  %v722_v24 = vmax.f32 %v706_v22, 1e-06  ;;  %v756_v36 = vadd.f32 %v755_v30, %v706_v22 }
 0x162   : > { %v744_v29 = vadd.f32 %v743_v23, %v736_v25  ;;  %v730_v33 = vmul.f32 %v722_v24, %v722_v24 }
 0x163   : > { %v697_v32 = vpop.f32.mrf.mxu3 }
 0x164   : > { %v698_v34 = vadd.f32 %v1164_v27, %v697_v32  ;;  %v738_v38 = vmul.f32 %v730_v33, %v722_v24  ;;  %v745_v39 = vadd.f32 %v744_v29, %v737_v35 }
 0x166   : > { %v707_v37 = vmax.f32 %v698_v34, 0.0  ;;  %v746_v28 = vadd.f32 %v745_v39, %v738_v38 }
 0x168   : > { %715 = vst [vmem:[%s1384_s17 + $0x38] sm:$0xff] %v707_v37  ;;  %v723_v40 = vmax.f32 %v707_v37, 1e-06  ;;  %v757_v42 = vadd.f32 %v756_v36, %v707_v37 }
 0x16a   : > { %v731_v43 = vmul.f32 %v723_v40, %v723_v40  ;;  %v774_v44 = vrot.slane %v757_v42, 4 }
 0x16c   : > { %v739_v46 = vmul.f32 %v731_v43, %v723_v40  ;;  %v775_v47 = vadd.f32 %v774_v44, %v757_v42 }
 0x16e   : > { %v747_v45 = vadd.f32 %v746_v28, %v739_v46  ;;  %v776_v48 = vrot.slane %v775_v47, 2 }
 0x170   : > { %v764_v31 = vrot.slane %v747_v45, 4  ;;  %v777_v27 = vadd.f32 %v776_v48, %v775_v47 }
 0x172   : > { %v765_v41 = vadd.f32 %v764_v31, %v747_v45  ;;  %v778_v49 = vrot.slane %v777_v27, 1 }
 0x174   : > { %v766_v50 = vrot.slane %v765_v41, 2  ;;  %v779_v51 = vadd.f32 %v778_v49, %v777_v27 }
 0x176   : > { %v767_v52 = vadd.f32 %v766_v50, %v765_v41  ;;  %v780_v53 = vmul.f32 0.015625, %v779_v51 }
 0x178   : > { %v768_v54 = vrot.slane %v767_v52, 1  ;;  %781 = vst [vmem:[%s416_s20] sm:$0x1] %v780_v53 }
 0x17a   : > { %v769_v55 = vadd.f32 %v768_v54, %v767_v52 }
 0x17c   : > { %v770_v56 = vmul.f32 0.015625, %v769_v55 }
 0x17e   : > { %v1082_v57 = vand.u32 2147483647, %v770_v56  ;;  %v1099_v5 = vand.u32 2147483648, %v770_v56  ;;  %vm1081_vm2 = vcmp.lt.f32.partialorder %v770_v56, 0.0  ;;  %vm1080_vm3 = vcmp.eq.f32.partialorder %v770_v56, 0.0 }
 0x180   : > { %1165 = vlog2.f32 %v1082_v57  ;;  %vm1096_vm0 = vweird.f32 %v1082_v57  ;;  %vm1098_vm1 = vcmp.eq.f32.partialorder %v1082_v57, 0.0  ;;  %vm1083_vm4 = vcmp.eq.f32.partialorder %v1082_v57, inf }
 0x186   : > { %v1166_v58 = vpop.eup %1165 }
 0x187   : > { %v1086_v59 = vmul.f32 -0.33333334, %v1166_v58 }
 0x189   : > { %1167 = vpow2.f32 %v1086_v59 }
 0x18f   : > { %v1168_v60 = vpop.eup %1167 }
 0x190   : > { %v1088_v61 = vmul.f32 %v1168_v60, %v1168_v60 }
 0x192   : > { %v1089_v62 = vmul.f32 %v1088_v61, %v1082_v57 }
 0x194   : > { %v1090_v63 = vmul.f32 %v1089_v62, %v1088_v61 }
 0x196   : > { %v1091_v0 = vsub.f32 %v1090_v63, %v1168_v60 }
 0x198   : > { %v1092_v1 = vmul.f32 -0.33333334, %v1091_v0 }
 0x19a   : > { %v1093_v2 = vadd.f32 %v1168_v60, %v1092_v1 }
 0x19c   : > { %v1094_v3 = vmul.f32 %v1093_v2, %v770_v56 }
 0x19e   : > { %v1095_v4 = vmul.f32 %v1094_v3, %v1093_v2 }
 0x1a0   : > { %v1097_v6 = vsel %vm1096_vm0, %v770_v56, %v1095_v4 }
 0x1a1   : > { %v1100_v7 = vsel %vm1098_vm1, %v1099_v5, %v1097_v6 }
 0x1a2   : > { %v1101_v8 = vsel %vm1081_vm2, nan, %v1100_v7 }
 0x1a3   : > { %v1102_v9 = vsel %vm1080_vm3, 0.0, %v1101_v8 }
 0x1a4   : > { %v1103_v10 = vsel %vm1083_vm4, inf, %v1102_v9 }
 0x1a5   : > { %772 = vst [vmem:[%s409_s21] sm:$0x1] %v1103_v10 }
 0x1a6 PF: > { %s18_s28 = sadd.s32 1, %s1207_s28   ;;  %s1429_s24 = smov %s1199_s26 }
 0x1a7   : > { %p15_p7 = scmp.ge.s32.totalorder %s18_s28, 6   ;;  %s1430_s25 = smov %s1203_s27 }
 0x1a8   : > { %s1431_s26 = smov %s1434_s29  ;;  %s1432_s27 = smov %s1438_s30 }
 0x1a9   :  { %17 = sbr.rel (!%p15_p7) target bundleno = 3 (0x3), region = 108 }

</bundles_post_ra>
